<compile_context>
chip_gen: v5e
topology: v5e:2x2
jax: 0.10.0
libtpu: 0.0.40
codegen_flags: <defaults>
</compile_context>

<pallas_src>
import jax
import jax.numpy as jnp
import numpy as np
from jax import lax
from jax.experimental import pallas as pl
from jax.experimental.pallas import tpu as pltpu


# ----------------------------- fused Pallas kernel ---------------------------

def _make_fused_kernel(num_layers, T, B, H):
    """Builds the fused kernel for fixed (num_layers, T, B, H)."""

    def kernel(*refs):
        x_ref = refs[0]                               # (T*B, D_in) bf16
        layer_refs = refs[1:1 + 3 * num_layers]       # per layer: w_ih_t, w_hh_t, bias
        fcw_ref = refs[1 + 3 * num_layers]            # (H, O)  f32
        fcb_ref = refs[2 + 3 * num_layers]            # (1, O)  f32
        out_ref = refs[3 + 3 * num_layers]            # (B, O)  f32

        # --- Hoist every weight/bias read out of the unrolled time loop -----
        # (Mosaic may not CSE repeated ref reads inside a fully unrolled body.)
        wih = [layer_refs[3 * l][...] for l in range(num_layers)]      # bf16
        whh = [layer_refs[3 * l + 1][...] for l in range(num_layers)]  # bf16
        bias = [layer_refs[3 * l + 2][...] for l in range(num_layers)] # f32

        # Layer-0 input projection for ALL timesteps: one recurrence-free MXU
        # pass, off the serial critical path.
        xp0 = (jnp.dot(x_ref[...], wih[0], preferred_element_type=jnp.float32)
               + bias[0])                             # (T*B, 4H) f32

        def cell(gates, c_prev):
            # g-gate columns were pre-scaled by 2 on the host, so ONE full-vreg
            # sigmoid covers all four gates; g = 2*sig - 1 == tanh(z).
            sig = jax.nn.sigmoid(gates)
            i_g = sig[:, 0 * H:1 * H]
            f_g = sig[:, 1 * H:2 * H]
            g_g = 2.0 * sig[:, 2 * H:3 * H] - 1.0
            o_g = sig[:, 3 * H:4 * H]
            c_new = f_g * c_prev + i_g * g_g
            h_new = o_g * jnp.tanh(c_new)
            return h_new, c_new

        h = [jnp.zeros((B, H), jnp.float32) for _ in range(num_layers)]
        c = [jnp.zeros((B, H), jnp.float32) for _ in range(num_layers)]

        # Wavefront recurrence: time outermost, every layer advances one step
        # per t.  T is small and static -> fully unrolled for LLO visibility.
        # TODO(synk): if T/B are ever scaled up, spill xp0 to a VMEM scratch
        # and switch to lax.fori_loop(..., unroll=2..4) to bound vreg pressure.
        for t in range(T):
            # Layer 0: hoisted x-projection + recurrent bf16 MXU push.
            g0 = xp0[t * B:(t + 1) * B, :] + jnp.dot(
                h[0].astype(jnp.bfloat16), whh[0],
                preferred_element_type=jnp.float32)
            h[0], c[0] = cell(g0, c[0])

            # Deeper layers: the h[l] @ W_hh term does not depend on this
            # step's h[l-1], so the scheduler can issue it while layer l-1 is
            # still computing (the wavefront overlap).
            for l in range(1, num_layers):
                gl = (jnp.dot(h[l].astype(jnp.bfloat16), whh[l],
                              preferred_element_type=jnp.float32)
                      + jnp.dot(h[l - 1].astype(jnp.bfloat16), wih[l],
                                preferred_element_type=jnp.float32)
                      + bias[l])
                h[l], c[l] = cell(gl, c[l])

        # Final Linear on the last layer's last hidden state (f32, runs once).
        out_ref[...] = (jnp.dot(h[-1], fcw_ref[...],
                                preferred_element_type=jnp.float32)
                        + fcb_ref[...]).astype(out_ref.dtype)

    return kernel


# --------------------------------- wrapper -----------------------------------

def wind_power_lstm_forward(x_btd, packed):
    """Forward pass matching WindPowerLSTM.forward.

    x_btd: (B, T, input_size), batch_first like PyTorch.
    packed: output of pack_params().
    Returns: (B, output_size) float32.
    """
    B, T, D_in = x_btd.shape
    H = packed["H"]
    O = packed["fc_w_t"].shape[1]
    num_layers = packed["num_layers"]

    # Time-major, flattened rows: row t*B + b holds x[b, t, :]; bf16 MXU operand.
    x_2d = jnp.transpose(x_btd, (1, 0, 2)).reshape(T * B, D_in).astype(jnp.bfloat16)

    ins = [x_2d]
    in_specs = [pl.BlockSpec((T * B, D_in), lambda i: (0, 0))]
    for layer in packed["lstm"]:
        d_in = layer["w_ih_t"].shape[0]
        ins += [layer["w_ih_t"], layer["w_hh_t"], layer["bias"]]
        in_specs += [
            pl.BlockSpec((d_in, 4 * H), lambda i: (0, 0)),
            pl.BlockSpec((H, 4 * H), lambda i: (0, 0)),
            pl.BlockSpec((1, 4 * H), lambda i: (0, 0)),
        ]
    ins += [packed["fc_w_t"], packed["fc_b"]]
    in_specs += [
        pl.BlockSpec((H, O), lambda i: (0, 0)),
        pl.BlockSpec((1, O), lambda i: (0, 0)),
    ]

    kernel = _make_fused_kernel(num_layers, T, B, H)

    # Total resident footprint is < 100 KB, far below the default scoped-VMEM
    # limit on v5e/v6e/v7x, so no vmem_limit override is needed.
    # TODO(synk): if H / num_layers grow, stream weights per layer (grid over
    # layers) and expose a parallel batch grid axis for v7x's second TC.
    return pl.pallas_call(
        kernel,
        out_shape=jax.ShapeDtypeStruct((B, O), jnp.float32),
        grid_spec=pltpu.PrefetchScalarGridSpec(
            num_scalar_prefetch=0,
            grid=(1,),
            in_specs=in_specs,
            out_specs=pl.BlockSpec((B, O), lambda i: (0, 0)),
        ),
        compiler_params=pltpu.CompilerParams(
            dimension_semantics=("arbitrary",),
        ),
    )(*ins)


# --------------------------- parameter construction --------------------------

def init_params(key, input_size, hidden_size, num_layers, output_size):
    """PyTorch-layout params (nn.LSTM / nn.Linear shapes, uniform(-k, k))."""
    params = {"lstm": []}
    k = 1.0 / np.sqrt(hidden_size)
    for layer in range(num_layers):
        d_in = input_size if layer == 0 else hidden_size
        key, k1, k2, k3, k4 = jax.random.split(key, 5)
        params["lstm"].append({
            "w_ih": jax.random.uniform(k1, (4 * hidden_size, d_in), jnp.float32, -k, k),
            "w_hh": jax.random.uniform(k2, (4 * hidden_size, hidden_size), jnp.float32, -k, k),
            "b_ih": jax.random.uniform(k3, (4 * hidden_size,), jnp.float32, -k, k),
            "b_hh": jax.random.uniform(k4, (4 * hidden_size,), jnp.float32, -k, k),
        })
    key, k5, k6 = jax.random.split(key, 3)
    params["fc_w"] = jax.random.uniform(k5, (output_size, hidden_size), jnp.float32, -k, k)
    params["fc_b"] = jax.random.uniform(k6, (output_size,), jnp.float32, -k, k)
    return params


def pack_params(params, hidden_size):
    """Host-side, one-time kernel-ready packing:
      - transpose to [in, 4H] layout,
      - pre-scale the g-gate columns by 2 (tanh via single sigmoid),
      - combine b_ih + b_hh,
      - cast matmul weights to bf16 (MXU operands); biases / FC stay f32.
    """
    H = hidden_size

    def scale_g(w_t):  # (rows, 4H): scale g-gate block so tanh(z) = 2*sig(2z)-1
        return w_t.at[:, 2 * H:3 * H].multiply(2.0)

    packed = {"H": H, "num_layers": len(params["lstm"]), "lstm": []}
    for lay in params["lstm"]:
        packed["lstm"].append({
            "w_ih_t": scale_g(lay["w_ih"].T).astype(jnp.bfloat16),   # (d_in, 4H)
            "w_hh_t": scale_g(lay["w_hh"].T).astype(jnp.bfloat16),   # (H, 4H)
            "bias": scale_g((lay["b_ih"] + lay["b_hh"])[None, :]),   # (1, 4H) f32
        })
    packed["fc_w_t"] = params["fc_w"].T                               # (H, O) f32
    packed["fc_b"] = params["fc_b"][None, :]                          # (1, O) f32
    return packed


# ------------------------------ pure-JAX reference ---------------------------

def reference_forward(x_btd, params):
    B = x_btd.shape[0]
    x = jnp.transpose(x_btd, (1, 0, 2))                  # (T, B, D)
    for lay in params["lstm"]:
        H = lay["w_hh"].shape[1]
        w_ih_t = lay["w_ih"].T
        w_hh_t = lay["w_hh"].T
        bias = (lay["b_ih"] + lay["b_hh"])[None, :]

        def step(carry, x_t, w_ih_t=w_ih_t, w_hh_t=w_hh_t, bias=bias, H=H):
            h, c = carry
            gates = x_t @ w_ih_t + h @ w_hh_t + bias
            i = jax.nn.sigmoid(gates[:, 0 * H:1 * H])
            f = jax.nn.sigmoid(gates[:, 1 * H:2 * H])
            g = jnp.tanh(gates[:, 2 * H:3 * H])
            o = jax.nn.sigmoid(gates[:, 3 * H:4 * H])
            c = f * c + i * g
            h = o * jnp.tanh(c)
            return (h, c), h

        init = (jnp.zeros((B, H), jnp.float32), jnp.zeros((B, H), jnp.float32))
        _, x = lax.scan(step, init, x)
    return x[-1] @ params["fc_w"].T + params["fc_b"][None, :]


# ----------------------------------- main -------------------------------------

if __name__ == "__main__":
    B, T = 8, 8
    input_size, hidden_size, num_layers, output_size = 16, 32, 2, 1

    key = jax.random.PRNGKey(0)
    key, xkey = jax.random.split(key)
    x = jax.random.normal(xkey, (B, T, input_size), jnp.float32)

    params = init_params(key, input_size, hidden_size, num_layers, output_size)
    packed = pack_params(params, hidden_size)

    out = jax.block_until_ready(wind_power_lstm_forward(x, packed))
    ref = jax.block_until_ready(reference_forward(x, params))

    # bf16 MXU operands -> looser tolerance than an all-f32 comparison.
    np.testing.assert_allclose(np.asarray(out), np.asarray(ref), rtol=2e-2, atol=2e-2)

    print("KERNEL_OK")
</pallas_src>

<mosaic_0001>
module attributes {stable_mosaic.version = 11 : i64} {
  func.func @kernel(%arg0: i32, %arg1: memref<64x16xbf16, #tpu.memory_space<vmem>>, %arg2: memref<16x128xbf16, #tpu.memory_space<vmem>>, %arg3: memref<32x128xbf16, #tpu.memory_space<vmem>>, %arg4: memref<1x128xf32, #tpu.memory_space<vmem>>, %arg5: memref<32x128xbf16, #tpu.memory_space<vmem>>, %arg6: memref<32x128xbf16, #tpu.memory_space<vmem>>, %arg7: memref<1x128xf32, #tpu.memory_space<vmem>>, %arg8: memref<32x1xf32, #tpu.memory_space<vmem>>, %arg9: memref<1x1xf32, #tpu.memory_space<vmem>>, %arg10: memref<8x1xf32, #tpu.memory_space<vmem>>) attributes {dimension_semantics = [#tpu.dimension_semantics<arbitrary>], iteration_bounds = array<i64: 1>, scalar_prefetch = 0 : i64, scratch_operands = 0 : i64, tpu.core_type = #tpu.core_type<tc>, window_params = [{pipeline_mode = #tpu.pipeline_mode<synchronous>, transform_indices = @transform_0, window_bounds = array<i64: 64, 16>}, {pipeline_mode = #tpu.pipeline_mode<synchronous>, transform_indices = @transform_1, window_bounds = array<i64: 16, 128>}, {pipeline_mode = #tpu.pipeline_mode<synchronous>, transform_indices = @transform_2, window_bounds = array<i64: 32, 128>}, {pipeline_mode = #tpu.pipeline_mode<synchronous>, transform_indices = @transform_3, window_bounds = array<i64: 1, 128>}, {pipeline_mode = #tpu.pipeline_mode<synchronous>, transform_indices = @transform_4, window_bounds = array<i64: 32, 128>}, {pipeline_mode = #tpu.pipeline_mode<synchronous>, transform_indices = @transform_5, window_bounds = array<i64: 32, 128>}, {pipeline_mode = #tpu.pipeline_mode<synchronous>, transform_indices = @transform_6, window_bounds = array<i64: 1, 128>}, {pipeline_mode = #tpu.pipeline_mode<synchronous>, transform_indices = @transform_7, window_bounds = array<i64: 32, 1>}, {pipeline_mode = #tpu.pipeline_mode<synchronous>, transform_indices = @transform_8, window_bounds = array<i64: 1, 1>}, {pipeline_mode = #tpu.pipeline_mode<synchronous>, transform_indices = @transform_9, window_bounds = array<i64: 8, 1>}]} {
    %c0 = arith.constant 0 : index
    %c0_0 = arith.constant 0 : index
    %0 = vector.load %arg2[%c0, %c0_0] : memref<16x128xbf16, #tpu.memory_space<vmem>>, vector<16x128xbf16>
    %c0_1 = arith.constant 0 : index
    %c0_2 = arith.constant 0 : index
    %1 = vector.load %arg5[%c0_1, %c0_2] : memref<32x128xbf16, #tpu.memory_space<vmem>>, vector<32x128xbf16>
    %c0_3 = arith.constant 0 : index
    %c0_4 = arith.constant 0 : index
    %2 = vector.load %arg3[%c0_3, %c0_4] : memref<32x128xbf16, #tpu.memory_space<vmem>>, vector<32x128xbf16>
    %c0_5 = arith.constant 0 : index
    %c0_6 = arith.constant 0 : index
    %3 = vector.load %arg6[%c0_5, %c0_6] : memref<32x128xbf16, #tpu.memory_space<vmem>>, vector<32x128xbf16>
    %c0_7 = arith.constant 0 : index
    %c0_8 = arith.constant 0 : index
    %4 = vector.load %arg4[%c0_7, %c0_8] : memref<1x128xf32, #tpu.memory_space<vmem>>, vector<1x128xf32>
    %c0_9 = arith.constant 0 : index
    %c0_10 = arith.constant 0 : index
    %5 = vector.load %arg7[%c0_9, %c0_10] : memref<1x128xf32, #tpu.memory_space<vmem>>, vector<1x128xf32>
    %c0_11 = arith.constant 0 : index
    %c0_12 = arith.constant 0 : index
    %6 = vector.load %arg1[%c0_11, %c0_12] : memref<64x16xbf16, #tpu.memory_space<vmem>>, vector<64x16xbf16>
    %cst = arith.constant dense<0.000000e+00> : vector<64x128xf32>
    %7 = tpu.matmul %6, %0, %cst {dimension_numbers = #tpu.dot_dimension_numbers<[1], [0], [0], [1], [0, 0, 1, 1], [], []>} : vector<64x16xbf16>, vector<16x128xbf16>, vector<64x128xf32> -> vector<64x128xf32>
    %8 = vector.broadcast %4 : vector<1x128xf32> to vector<64x128xf32>
    %9 = arith.addf %7, %8 : vector<64x128xf32>
    %cst_13 = arith.constant 0.000000e+00 : f32
    %10 = vector.broadcast %cst_13 : f32 to vector<8x32xf32>
    %cst_14 = arith.constant 0.000000e+00 : f32
    %11 = vector.broadcast %cst_14 : f32 to vector<8x32xf32>
    %cst_15 = arith.constant 0.000000e+00 : f32
    %12 = vector.broadcast %cst_15 : f32 to vector<8x32xf32>
    %cst_16 = arith.constant 0.000000e+00 : f32
    %13 = vector.broadcast %cst_16 : f32 to vector<8x32xf32>
    %14 = vector.extract_strided_slice %9 {offsets = [0, 0], sizes = [8, 128], strides = [1, 1]} : vector<64x128xf32> to vector<8x128xf32>
    %15 = arith.truncf %10 : vector<8x32xf32> to vector<8x32xbf16>
    %cst_17 = arith.constant dense<0.000000e+00> : vector<8x128xf32>
    %16 = tpu.matmul %15, %2, %cst_17 {dimension_numbers = #tpu.dot_dimension_numbers<[1], [0], [0], [1], [0, 0, 1, 1], [], []>} : vector<8x32xbf16>, vector<32x128xbf16>, vector<8x128xf32> -> vector<8x128xf32>
    %17 = arith.addf %14, %16 : vector<8x128xf32>
    %18 = arith.negf %17 : vector<8x128xf32>
    %19 = math.exp %18 : vector<8x128xf32>
    %cst_18 = arith.constant 1.000000e+00 : f32
    %20 = vector.broadcast %cst_18 : f32 to vector<8x128xf32>
    %21 = arith.addf %20, %19 : vector<8x128xf32>
    %22 = arith.divf %20, %21 : vector<8x128xf32>
    %23 = vector.extract_strided_slice %22 {offsets = [0, 0], sizes = [8, 32], strides = [1, 1]} : vector<8x128xf32> to vector<8x32xf32>
    %24 = vector.extract_strided_slice %22 {offsets = [0, 32], sizes = [8, 32], strides = [1, 1]} : vector<8x128xf32> to vector<8x32xf32>
    %25 = vector.extract_strided_slice %22 {offsets = [0, 64], sizes = [8, 32], strides = [1, 1]} : vector<8x128xf32> to vector<8x32xf32>
    %cst_19 = arith.constant 2.000000e+00 : f32
    %26 = vector.broadcast %cst_19 : f32 to vector<8x32xf32>
    %27 = arith.mulf %26, %25 : vector<8x32xf32>
    %cst_20 = arith.constant 1.000000e+00 : f32
    %28 = vector.broadcast %cst_20 : f32 to vector<8x32xf32>
    %29 = arith.subf %27, %28 : vector<8x32xf32>
    %30 = vector.extract_strided_slice %22 {offsets = [0, 96], sizes = [8, 32], strides = [1, 1]} : vector<8x128xf32> to vector<8x32xf32>
    %31 = arith.mulf %24, %12 : vector<8x32xf32>
    %32 = arith.mulf %23, %29 : vector<8x32xf32>
    %33 = arith.addf %31, %32 : vector<8x32xf32>
    %34 = math.tanh %33 : vector<8x32xf32>
    %35 = arith.mulf %30, %34 : vector<8x32xf32>
    %36 = arith.truncf %11 : vector<8x32xf32> to vector<8x32xbf16>
    %cst_21 = arith.constant dense<0.000000e+00> : vector<8x128xf32>
    %37 = tpu.matmul %36, %3, %cst_21 {dimension_numbers = #tpu.dot_dimension_numbers<[1], [0], [0], [1], [0, 0, 1, 1], [], []>} : vector<8x32xbf16>, vector<32x128xbf16>, vector<8x128xf32> -> vector<8x128xf32>
    %38 = arith.truncf %35 : vector<8x32xf32> to vector<8x32xbf16>
    %cst_22 = arith.constant dense<0.000000e+00> : vector<8x128xf32>
    %39 = tpu.matmul %38, %1, %cst_22 {dimension_numbers = #tpu.dot_dimension_numbers<[1], [0], [0], [1], [0, 0, 1, 1], [], []>} : vector<8x32xbf16>, vector<32x128xbf16>, vector<8x128xf32> -> vector<8x128xf32>
    %40 = arith.addf %37, %39 : vector<8x128xf32>
    %41 = vector.broadcast %5 : vector<1x128xf32> to vector<8x128xf32>
    %42 = arith.addf %40, %41 : vector<8x128xf32>
    %43 = arith.negf %42 : vector<8x128xf32>
    %44 = math.exp %43 : vector<8x128xf32>
    %cst_23 = arith.constant 1.000000e+00 : f32
    %45 = vector.broadcast %cst_23 : f32 to vector<8x128xf32>
    %46 = arith.addf %45, %44 : vector<8x128xf32>
    %47 = arith.divf %45, %46 : vector<8x128xf32>
    %48 = vector.extract_strided_slice %47 {offsets = [0, 0], sizes = [8, 32], strides = [1, 1]} : vector<8x128xf32> to vector<8x32xf32>
    %49 = vector.extract_strided_slice %47 {offsets = [0, 32], sizes = [8, 32], strides = [1, 1]} : vector<8x128xf32> to vector<8x32xf32>
    %50 = vector.extract_strided_slice %47 {offsets = [0, 64], sizes = [8, 32], strides = [1, 1]} : vector<8x128xf32> to vector<8x32xf32>
    %cst_24 = arith.constant 2.000000e+00 : f32
    %51 = vector.broadcast %cst_24 : f32 to vector<8x32xf32>
    %52 = arith.mulf %51, %50 : vector<8x32xf32>
    %cst_25 = arith.constant 1.000000e+00 : f32
    %53 = vector.broadcast %cst_25 : f32 to vector<8x32xf32>
    %54 = arith.subf %52, %53 : vector<8x32xf32>
    %55 = vector.extract_strided_slice %47 {offsets = [0, 96], sizes = [8, 32], strides = [1, 1]} : vector<8x128xf32> to vector<8x32xf32>
    %56 = arith.mulf %49, %13 : vector<8x32xf32>
    %57 = arith.mulf %48, %54 : vector<8x32xf32>
    %58 = arith.addf %56, %57 : vector<8x32xf32>
    %59 = math.tanh %58 : vector<8x32xf32>
    %60 = arith.mulf %55, %59 : vector<8x32xf32>
    %61 = vector.extract_strided_slice %9 {offsets = [8, 0], sizes = [8, 128], strides = [1, 1]} : vector<64x128xf32> to vector<8x128xf32>
    %62 = arith.truncf %35 : vector<8x32xf32> to vector<8x32xbf16>
    %cst_26 = arith.constant dense<0.000000e+00> : vector<8x128xf32>
    %63 = tpu.matmul %62, %2, %cst_26 {dimension_numbers = #tpu.dot_dimension_numbers<[1], [0], [0], [1], [0, 0, 1, 1], [], []>} : vector<8x32xbf16>, vector<32x128xbf16>, vector<8x128xf32> -> vector<8x128xf32>
    %64 = arith.addf %61, %63 : vector<8x128xf32>
    %65 = arith.negf %64 : vector<8x128xf32>
    %66 = math.exp %65 : vector<8x128xf32>
    %cst_27 = arith.constant 1.000000e+00 : f32
    %67 = vector.broadcast %cst_27 : f32 to vector<8x128xf32>
    %68 = arith.addf %67, %66 : vector<8x128xf32>
    %69 = arith.divf %67, %68 : vector<8x128xf32>
    %70 = vector.extract_strided_slice %69 {offsets = [0, 0], sizes = [8, 32], strides = [1, 1]} : vector<8x128xf32> to vector<8x32xf32>
    %71 = vector.extract_strided_slice %69 {offsets = [0, 32], sizes = [8, 32], strides = [1, 1]} : vector<8x128xf32> to vector<8x32xf32>
    %72 = vector.extract_strided_slice %69 {offsets = [0, 64], sizes = [8, 32], strides = [1, 1]} : vector<8x128xf32> to vector<8x32xf32>
    %cst_28 = arith.constant 2.000000e+00 : f32
    %73 = vector.broadcast %cst_28 : f32 to vector<8x32xf32>
    %74 = arith.mulf %73, %72 : vector<8x32xf32>
    %cst_29 = arith.constant 1.000000e+00 : f32
    %75 = vector.broadcast %cst_29 : f32 to vector<8x32xf32>
    %76 = arith.subf %74, %75 : vector<8x32xf32>
    %77 = vector.extract_strided_slice %69 {offsets = [0, 96], sizes = [8, 32], strides = [1, 1]} : vector<8x128xf32> to vector<8x32xf32>
    %78 = arith.mulf %71, %33 : vector<8x32xf32>
    %79 = arith.mulf %70, %76 : vector<8x32xf32>
    %80 = arith.addf %78, %79 : vector<8x32xf32>
    %81 = math.tanh %80 : vector<8x32xf32>
    %82 = arith.mulf %77, %81 : vector<8x32xf32>
    %83 = arith.truncf %60 : vector<8x32xf32> to vector<8x32xbf16>
    %cst_30 = arith.constant dense<0.000000e+00> : vector<8x128xf32>
    %84 = tpu.matmul %83, %3, %cst_30 {dimension_numbers = #tpu.dot_dimension_numbers<[1], [0], [0], [1], [0, 0, 1, 1], [], []>} : vector<8x32xbf16>, vector<32x128xbf16>, vector<8x128xf32> -> vector<8x128xf32>
    %85 = arith.truncf %82 : vector<8x32xf32> to vector<8x32xbf16>
    %cst_31 = arith.constant dense<0.000000e+00> : vector<8x128xf32>
    %86 = tpu.matmul %85, %1, %cst_31 {dimension_numbers = #tpu.dot_dimension_numbers<[1], [0], [0], [1], [0, 0, 1, 1], [], []>} : vector<8x32xbf16>, vector<32x128xbf16>, vector<8x128xf32> -> vector<8x128xf32>
    %87 = arith.addf %84, %86 : vector<8x128xf32>
    %88 = vector.broadcast %5 : vector<1x128xf32> to vector<8x128xf32>
    %89 = arith.addf %87, %88 : vector<8x128xf32>
    %90 = arith.negf %89 : vector<8x128xf32>
    %91 = math.exp %90 : vector<8x128xf32>
    %cst_32 = arith.constant 1.000000e+00 : f32
    %92 = vector.broadcast %cst_32 : f32 to vector<8x128xf32>
    %93 = arith.addf %92, %91 : vector<8x128xf32>
    %94 = arith.divf %92, %93 : vector<8x128xf32>
    %95 = vector.extract_strided_slice %94 {offsets = [0, 0], sizes = [8, 32], strides = [1, 1]} : vector<8x128xf32> to vector<8x32xf32>
    %96 = vector.extract_strided_slice %94 {offsets = [0, 32], sizes = [8, 32], strides = [1, 1]} : vector<8x128xf32> to vector<8x32xf32>
    %97 = vector.extract_strided_slice %94 {offsets = [0, 64], sizes = [8, 32], strides = [1, 1]} : vector<8x128xf32> to vector<8x32xf32>
    %cst_33 = arith.constant 2.000000e+00 : f32
    %98 = vector.broadcast %cst_33 : f32 to vector<8x32xf32>
    %99 = arith.mulf %98, %97 : vector<8x32xf32>
    %cst_34 = arith.constant 1.000000e+00 : f32
    %100 = vector.broadcast %cst_34 : f32 to vector<8x32xf32>
    %101 = arith.subf %99, %100 : vector<8x32xf32>
    %102 = vector.extract_strided_slice %94 {offsets = [0, 96], sizes = [8, 32], strides = [1, 1]} : vector<8x128xf32> to vector<8x32xf32>
    %103 = arith.mulf %96, %58 : vector<8x32xf32>
    %104 = arith.mulf %95, %101 : vector<8x32xf32>
    %105 = arith.addf %103, %104 : vector<8x32xf32>
    %106 = math.tanh %105 : vector<8x32xf32>
    %107 = arith.mulf %102, %106 : vector<8x32xf32>
    %108 = vector.extract_strided_slice %9 {offsets = [16, 0], sizes = [8, 128], strides = [1, 1]} : vector<64x128xf32> to vector<8x128xf32>
    %109 = arith.truncf %82 : vector<8x32xf32> to vector<8x32xbf16>
    %cst_35 = arith.constant dense<0.000000e+00> : vector<8x128xf32>
    %110 = tpu.matmul %109, %2, %cst_35 {dimension_numbers = #tpu.dot_dimension_numbers<[1], [0], [0], [1], [0, 0, 1, 1], [], []>} : vector<8x32xbf16>, vector<32x128xbf16>, vector<8x128xf32> -> vector<8x128xf32>
    %111 = arith.addf %108, %110 : vector<8x128xf32>
    %112 = arith.negf %111 : vector<8x128xf32>
    %113 = math.exp %112 : vector<8x128xf32>
    %cst_36 = arith.constant 1.000000e+00 : f32
    %114 = vector.broadcast %cst_36 : f32 to vector<8x128xf32>
    %115 = arith.addf %114, %113 : vector<8x128xf32>
    %116 = arith.divf %114, %115 : vector<8x128xf32>
    %117 = vector.extract_strided_slice %116 {offsets = [0, 0], sizes = [8, 32], strides = [1, 1]} : vector<8x128xf32> to vector<8x32xf32>
    %118 = vector.extract_strided_slice %116 {offsets = [0, 32], sizes = [8, 32], strides = [1, 1]} : vector<8x128xf32> to vector<8x32xf32>
    %119 = vector.extract_strided_slice %116 {offsets = [0, 64], sizes = [8, 32], strides = [1, 1]} : vector<8x128xf32> to vector<8x32xf32>
    %cst_37 = arith.constant 2.000000e+00 : f32
    %120 = vector.broadcast %cst_37 : f32 to vector<8x32xf32>
    %121 = arith.mulf %120, %119 : vector<8x32xf32>
    %cst_38 = arith.constant 1.000000e+00 : f32
    %122 = vector.broadcast %cst_38 : f32 to vector<8x32xf32>
    %123 = arith.subf %121, %122 : vector<8x32xf32>
    %124 = vector.extract_strided_slice %116 {offsets = [0, 96], sizes = [8, 32], strides = [1, 1]} : vector<8x128xf32> to vector<8x32xf32>
    %125 = arith.mulf %118, %80 : vector<8x32xf32>
    %126 = arith.mulf %117, %123 : vector<8x32xf32>
    %127 = arith.addf %125, %126 : vector<8x32xf32>
    %128 = math.tanh %127 : vector<8x32xf32>
    %129 = arith.mulf %124, %128 : vector<8x32xf32>
    %130 = arith.truncf %107 : vector<8x32xf32> to vector<8x32xbf16>
    %cst_39 = arith.constant dense<0.000000e+00> : vector<8x128xf32>
    %131 = tpu.matmul %130, %3, %cst_39 {dimension_numbers = #tpu.dot_dimension_numbers<[1], [0], [0], [1], [0, 0, 1, 1], [], []>} : vector<8x32xbf16>, vector<32x128xbf16>, vector<8x128xf32> -> vector<8x128xf32>
    %132 = arith.truncf %129 : vector<8x32xf32> to vector<8x32xbf16>
    %cst_40 = arith.constant dense<0.000000e+00> : vector<8x128xf32>
    %133 = tpu.matmul %132, %1, %cst_40 {dimension_numbers = #tpu.dot_dimension_numbers<[1], [0], [0], [1], [0, 0, 1, 1], [], []>} : vector<8x32xbf16>, vector<32x128xbf16>, vector<8x128xf32> -> vector<8x128xf32>
    %134 = arith.addf %131, %133 : vector<8x128xf32>
    %135 = vector.broadcast %5 : vector<1x128xf32> to vector<8x128xf32>
    %136 = arith.addf %134, %135 : vector<8x128xf32>
    %137 = arith.negf %136 : vector<8x128xf32>
    %138 = math.exp %137 : vector<8x128xf32>
    %cst_41 = arith.constant 1.000000e+00 : f32
    %139 = vector.broadcast %cst_41 : f32 to vector<8x128xf32>
    %140 = arith.addf %139, %138 : vector<8x128xf32>
    %141 = arith.divf %139, %140 : vector<8x128xf32>
    %142 = vector.extract_strided_slice %141 {offsets = [0, 0], sizes = [8, 32], strides = [1, 1]} : vector<8x128xf32> to vector<8x32xf32>
    %143 = vector.extract_strided_slice %141 {offsets = [0, 32], sizes = [8, 32], strides = [1, 1]} : vector<8x128xf32> to vector<8x32xf32>
    %144 = vector.extract_strided_slice %141 {offsets = [0, 64], sizes = [8, 32], strides = [1, 1]} : vector<8x128xf32> to vector<8x32xf32>
    %cst_42 = arith.constant 2.000000e+00 : f32
    %145 = vector.broadcast %cst_42 : f32 to vector<8x32xf32>
    %146 = arith.mulf %145, %144 : vector<8x32xf32>
    %cst_43 = arith.constant 1.000000e+00 : f32
    %147 = vector.broadcast %cst_43 : f32 to vector<8x32xf32>
    %148 = arith.subf %146, %147 : vector<8x32xf32>
    %149 = vector.extract_strided_slice %141 {offsets = [0, 96], sizes = [8, 32], strides = [1, 1]} : vector<8x128xf32> to vector<8x32xf32>
    %150 = arith.mulf %143, %105 : vector<8x32xf32>
    %151 = arith.mulf %142, %148 : vector<8x32xf32>
    %152 = arith.addf %150, %151 : vector<8x32xf32>
    %153 = math.tanh %152 : vector<8x32xf32>
    %154 = arith.mulf %149, %153 : vector<8x32xf32>
    %155 = vector.extract_strided_slice %9 {offsets = [24, 0], sizes = [8, 128], strides = [1, 1]} : vector<64x128xf32> to vector<8x128xf32>
    %156 = arith.truncf %129 : vector<8x32xf32> to vector<8x32xbf16>
    %cst_44 = arith.constant dense<0.000000e+00> : vector<8x128xf32>
    %157 = tpu.matmul %156, %2, %cst_44 {dimension_numbers = #tpu.dot_dimension_numbers<[1], [0], [0], [1], [0, 0, 1, 1], [], []>} : vector<8x32xbf16>, vector<32x128xbf16>, vector<8x128xf32> -> vector<8x128xf32>
    %158 = arith.addf %155, %157 : vector<8x128xf32>
    %159 = arith.negf %158 : vector<8x128xf32>
    %160 = math.exp %159 : vector<8x128xf32>
    %cst_45 = arith.constant 1.000000e+00 : f32
    %161 = vector.broadcast %cst_45 : f32 to vector<8x128xf32>
    %162 = arith.addf %161, %160 : vector<8x128xf32>
    %163 = arith.divf %161, %162 : vector<8x128xf32>
    %164 = vector.extract_strided_slice %163 {offsets = [0, 0], sizes = [8, 32], strides = [1, 1]} : vector<8x128xf32> to vector<8x32xf32>
    %165 = vector.extract_strided_slice %163 {offsets = [0, 32], sizes = [8, 32], strides = [1, 1]} : vector<8x128xf32> to vector<8x32xf32>
    %166 = vector.extract_strided_slice %163 {offsets = [0, 64], sizes = [8, 32], strides = [1, 1]} : vector<8x128xf32> to vector<8x32xf32>
    %cst_46 = arith.constant 2.000000e+00 : f32
    %167 = vector.broadcast %cst_46 : f32 to vector<8x32xf32>
    %168 = arith.mulf %167, %166 : vector<8x32xf32>
    %cst_47 = arith.constant 1.000000e+00 : f32
    %169 = vector.broadcast %cst_47 : f32 to vector<8x32xf32>
    %170 = arith.subf %168, %169 : vector<8x32xf32>
    %171 = vector.extract_strided_slice %163 {offsets = [0, 96], sizes = [8, 32], strides = [1, 1]} : vector<8x128xf32> to vector<8x32xf32>
    %172 = arith.mulf %165, %127 : vector<8x32xf32>
    %173 = arith.mulf %164, %170 : vector<8x32xf32>
    %174 = arith.addf %172, %173 : vector<8x32xf32>
    %175 = math.tanh %174 : vector<8x32xf32>
    %176 = arith.mulf %171, %175 : vector<8x32xf32>
    %177 = arith.truncf %154 : vector<8x32xf32> to vector<8x32xbf16>
    %cst_48 = arith.constant dense<0.000000e+00> : vector<8x128xf32>
    %178 = tpu.matmul %177, %3, %cst_48 {dimension_numbers = #tpu.dot_dimension_numbers<[1], [0], [0], [1], [0, 0, 1, 1], [], []>} : vector<8x32xbf16>, vector<32x128xbf16>, vector<8x128xf32> -> vector<8x128xf32>
    %179 = arith.truncf %176 : vector<8x32xf32> to vector<8x32xbf16>
    %cst_49 = arith.constant dense<0.000000e+00> : vector<8x128xf32>
    %180 = tpu.matmul %179, %1, %cst_49 {dimension_numbers = #tpu.dot_dimension_numbers<[1], [0], [0], [1], [0, 0, 1, 1], [], []>} : vector<8x32xbf16>, vector<32x128xbf16>, vector<8x128xf32> -> vector<8x128xf32>
    %181 = arith.addf %178, %180 : vector<8x128xf32>
    %182 = vector.broadcast %5 : vector<1x128xf32> to vector<8x128xf32>
    %183 = arith.addf %181, %182 : vector<8x128xf32>
    %184 = arith.negf %183 : vector<8x128xf32>
    %185 = math.exp %184 : vector<8x128xf32>
    %cst_50 = arith.constant 1.000000e+00 : f32
    %186 = vector.broadcast %cst_50 : f32 to vector<8x128xf32>
    %187 = arith.addf %186, %185 : vector<8x128xf32>
    %188 = arith.divf %186, %187 : vector<8x128xf32>
    %189 = vector.extract_strided_slice %188 {offsets = [0, 0], sizes = [8, 32], strides = [1, 1]} : vector<8x128xf32> to vector<8x32xf32>
    %190 = vector.extract_strided_slice %188 {offsets = [0, 32], sizes = [8, 32], strides = [1, 1]} : vector<8x128xf32> to vector<8x32xf32>
    %191 = vector.extract_strided_slice %188 {offsets = [0, 64], sizes = [8, 32], strides = [1, 1]} : vector<8x128xf32> to vector<8x32xf32>
    %cst_51 = arith.constant 2.000000e+00 : f32
    %192 = vector.broadcast %cst_51 : f32 to vector<8x32xf32>
    %193 = arith.mulf %192, %191 : vector<8x32xf32>
    %cst_52 = arith.constant 1.000000e+00 : f32
    %194 = vector.broadcast %cst_52 : f32 to vector<8x32xf32>
    %195 = arith.subf %193, %194 : vector<8x32xf32>
    %196 = vector.extract_strided_slice %188 {offsets = [0, 96], sizes = [8, 32], strides = [1, 1]} : vector<8x128xf32> to vector<8x32xf32>
    %197 = arith.mulf %190, %152 : vector<8x32xf32>
    %198 = arith.mulf %189, %195 : vector<8x32xf32>
    %199 = arith.addf %197, %198 : vector<8x32xf32>
    %200 = math.tanh %199 : vector<8x32xf32>
    %201 = arith.mulf %196, %200 : vector<8x32xf32>
    %202 = vector.extract_strided_slice %9 {offsets = [32, 0], sizes = [8, 128], strides = [1, 1]} : vector<64x128xf32> to vector<8x128xf32>
    %203 = arith.truncf %176 : vector<8x32xf32> to vector<8x32xbf16>
    %cst_53 = arith.constant dense<0.000000e+00> : vector<8x128xf32>
    %204 = tpu.matmul %203, %2, %cst_53 {dimension_numbers = #tpu.dot_dimension_numbers<[1], [0], [0], [1], [0, 0, 1, 1], [], []>} : vector<8x32xbf16>, vector<32x128xbf16>, vector<8x128xf32> -> vector<8x128xf32>
    %205 = arith.addf %202, %204 : vector<8x128xf32>
    %206 = arith.negf %205 : vector<8x128xf32>
    %207 = math.exp %206 : vector<8x128xf32>
    %cst_54 = arith.constant 1.000000e+00 : f32
    %208 = vector.broadcast %cst_54 : f32 to vector<8x128xf32>
    %209 = arith.addf %208, %207 : vector<8x128xf32>
    %210 = arith.divf %208, %209 : vector<8x128xf32>
    %211 = vector.extract_strided_slice %210 {offsets = [0, 0], sizes = [8, 32], strides = [1, 1]} : vector<8x128xf32> to vector<8x32xf32>
    %212 = vector.extract_strided_slice %210 {offsets = [0, 32], sizes = [8, 32], strides = [1, 1]} : vector<8x128xf32> to vector<8x32xf32>
    %213 = vector.extract_strided_slice %210 {offsets = [0, 64], sizes = [8, 32], strides = [1, 1]} : vector<8x128xf32> to vector<8x32xf32>
    %cst_55 = arith.constant 2.000000e+00 : f32
    %214 = vector.broadcast %cst_55 : f32 to vector<8x32xf32>
    %215 = arith.mulf %214, %213 : vector<8x32xf32>
    %cst_56 = arith.constant 1.000000e+00 : f32
    %216 = vector.broadcast %cst_56 : f32 to vector<8x32xf32>
    %217 = arith.subf %215, %216 : vector<8x32xf32>
    %218 = vector.extract_strided_slice %210 {offsets = [0, 96], sizes = [8, 32], strides = [1, 1]} : vector<8x128xf32> to vector<8x32xf32>
    %219 = arith.mulf %212, %174 : vector<8x32xf32>
    %220 = arith.mulf %211, %217 : vector<8x32xf32>
    %221 = arith.addf %219, %220 : vector<8x32xf32>
    %222 = math.tanh %221 : vector<8x32xf32>
    %223 = arith.mulf %218, %222 : vector<8x32xf32>
    %224 = arith.truncf %201 : vector<8x32xf32> to vector<8x32xbf16>
    %cst_57 = arith.constant dense<0.000000e+00> : vector<8x128xf32>
    %225 = tpu.matmul %224, %3, %cst_57 {dimension_numbers = #tpu.dot_dimension_numbers<[1], [0], [0], [1], [0, 0, 1, 1], [], []>} : vector<8x32xbf16>, vector<32x128xbf16>, vector<8x128xf32> -> vector<8x128xf32>
    %226 = arith.truncf %223 : vector<8x32xf32> to vector<8x32xbf16>
    %cst_58 = arith.constant dense<0.000000e+00> : vector<8x128xf32>
    %227 = tpu.matmul %226, %1, %cst_58 {dimension_numbers = #tpu.dot_dimension_numbers<[1], [0], [0], [1], [0, 0, 1, 1], [], []>} : vector<8x32xbf16>, vector<32x128xbf16>, vector<8x128xf32> -> vector<8x128xf32>
    %228 = arith.addf %225, %227 : vector<8x128xf32>
    %229 = vector.broadcast %5 : vector<1x128xf32> to vector<8x128xf32>
    %230 = arith.addf %228, %229 : vector<8x128xf32>
    %231 = arith.negf %230 : vector<8x128xf32>
    %232 = math.exp %231 : vector<8x128xf32>
    %cst_59 = arith.constant 1.000000e+00 : f32
    %233 = vector.broadcast %cst_59 : f32 to vector<8x128xf32>
    %234 = arith.addf %233, %232 : vector<8x128xf32>
    %235 = arith.divf %233, %234 : vector<8x128xf32>
    %236 = vector.extract_strided_slice %235 {offsets = [0, 0], sizes = [8, 32], strides = [1, 1]} : vector<8x128xf32> to vector<8x32xf32>
    %237 = vector.extract_strided_slice %235 {offsets = [0, 32], sizes = [8, 32], strides = [1, 1]} : vector<8x128xf32> to vector<8x32xf32>
    %238 = vector.extract_strided_slice %235 {offsets = [0, 64], sizes = [8, 32], strides = [1, 1]} : vector<8x128xf32> to vector<8x32xf32>
    %cst_60 = arith.constant 2.000000e+00 : f32
    %239 = vector.broadcast %cst_60 : f32 to vector<8x32xf32>
    %240 = arith.mulf %239, %238 : vector<8x32xf32>
    %cst_61 = arith.constant 1.000000e+00 : f32
    %241 = vector.broadcast %cst_61 : f32 to vector<8x32xf32>
    %242 = arith.subf %240, %241 : vector<8x32xf32>
    %243 = vector.extract_strided_slice %235 {offsets = [0, 96], sizes = [8, 32], strides = [1, 1]} : vector<8x128xf32> to vector<8x32xf32>
    %244 = arith.mulf %237, %199 : vector<8x32xf32>
    %245 = arith.mulf %236, %242 : vector<8x32xf32>
    %246 = arith.addf %244, %245 : vector<8x32xf32>
    %247 = math.tanh %246 : vector<8x32xf32>
    %248 = arith.mulf %243, %247 : vector<8x32xf32>
    %249 = vector.extract_strided_slice %9 {offsets = [40, 0], sizes = [8, 128], strides = [1, 1]} : vector<64x128xf32> to vector<8x128xf32>
    %250 = arith.truncf %223 : vector<8x32xf32> to vector<8x32xbf16>
    %cst_62 = arith.constant dense<0.000000e+00> : vector<8x128xf32>
    %251 = tpu.matmul %250, %2, %cst_62 {dimension_numbers = #tpu.dot_dimension_numbers<[1], [0], [0], [1], [0, 0, 1, 1], [], []>} : vector<8x32xbf16>, vector<32x128xbf16>, vector<8x128xf32> -> vector<8x128xf32>
    %252 = arith.addf %249, %251 : vector<8x128xf32>
    %253 = arith.negf %252 : vector<8x128xf32>
    %254 = math.exp %253 : vector<8x128xf32>
    %cst_63 = arith.constant 1.000000e+00 : f32
    %255 = vector.broadcast %cst_63 : f32 to vector<8x128xf32>
    %256 = arith.addf %255, %254 : vector<8x128xf32>
    %257 = arith.divf %255, %256 : vector<8x128xf32>
    %258 = vector.extract_strided_slice %257 {offsets = [0, 0], sizes = [8, 32], strides = [1, 1]} : vector<8x128xf32> to vector<8x32xf32>
    %259 = vector.extract_strided_slice %257 {offsets = [0, 32], sizes = [8, 32], strides = [1, 1]} : vector<8x128xf32> to vector<8x32xf32>
    %260 = vector.extract_strided_slice %257 {offsets = [0, 64], sizes = [8, 32], strides = [1, 1]} : vector<8x128xf32> to vector<8x32xf32>
    %cst_64 = arith.constant 2.000000e+00 : f32
    %261 = vector.broadcast %cst_64 : f32 to vector<8x32xf32>
    %262 = arith.mulf %261, %260 : vector<8x32xf32>
    %cst_65 = arith.constant 1.000000e+00 : f32
    %263 = vector.broadcast %cst_65 : f32 to vector<8x32xf32>
    %264 = arith.subf %262, %263 : vector<8x32xf32>
    %265 = vector.extract_strided_slice %257 {offsets = [0, 96], sizes = [8, 32], strides = [1, 1]} : vector<8x128xf32> to vector<8x32xf32>
    %266 = arith.mulf %259, %221 : vector<8x32xf32>
    %267 = arith.mulf %258, %264 : vector<8x32xf32>
    %268 = arith.addf %266, %267 : vector<8x32xf32>
    %269 = math.tanh %268 : vector<8x32xf32>
    %270 = arith.mulf %265, %269 : vector<8x32xf32>
    %271 = arith.truncf %248 : vector<8x32xf32> to vector<8x32xbf16>
    %cst_66 = arith.constant dense<0.000000e+00> : vector<8x128xf32>
    %272 = tpu.matmul %271, %3, %cst_66 {dimension_numbers = #tpu.dot_dimension_numbers<[1], [0], [0], [1], [0, 0, 1, 1], [], []>} : vector<8x32xbf16>, vector<32x128xbf16>, vector<8x128xf32> -> vector<8x128xf32>
    %273 = arith.truncf %270 : vector<8x32xf32> to vector<8x32xbf16>
    %cst_67 = arith.constant dense<0.000000e+00> : vector<8x128xf32>
    %274 = tpu.matmul %273, %1, %cst_67 {dimension_numbers = #tpu.dot_dimension_numbers<[1], [0], [0], [1], [0, 0, 1, 1], [], []>} : vector<8x32xbf16>, vector<32x128xbf16>, vector<8x128xf32> -> vector<8x128xf32>
    %275 = arith.addf %272, %274 : vector<8x128xf32>
    %276 = vector.broadcast %5 : vector<1x128xf32> to vector<8x128xf32>
    %277 = arith.addf %275, %276 : vector<8x128xf32>
    %278 = arith.negf %277 : vector<8x128xf32>
    %279 = math.exp %278 : vector<8x128xf32>
    %cst_68 = arith.constant 1.000000e+00 : f32
    %280 = vector.broadcast %cst_68 : f32 to vector<8x128xf32>
    %281 = arith.addf %280, %279 : vector<8x128xf32>
    %282 = arith.divf %280, %281 : vector<8x128xf32>
    %283 = vector.extract_strided_slice %282 {offsets = [0, 0], sizes = [8, 32], strides = [1, 1]} : vector<8x128xf32> to vector<8x32xf32>
    %284 = vector.extract_strided_slice %282 {offsets = [0, 32], sizes = [8, 32], strides = [1, 1]} : vector<8x128xf32> to vector<8x32xf32>
    %285 = vector.extract_strided_slice %282 {offsets = [0, 64], sizes = [8, 32], strides = [1, 1]} : vector<8x128xf32> to vector<8x32xf32>
    %cst_69 = arith.constant 2.000000e+00 : f32
    %286 = vector.broadcast %cst_69 : f32 to vector<8x32xf32>
    %287 = arith.mulf %286, %285 : vector<8x32xf32>
    %cst_70 = arith.constant 1.000000e+00 : f32
    %288 = vector.broadcast %cst_70 : f32 to vector<8x32xf32>
    %289 = arith.subf %287, %288 : vector<8x32xf32>
    %290 = vector.extract_strided_slice %282 {offsets = [0, 96], sizes = [8, 32], strides = [1, 1]} : vector<8x128xf32> to vector<8x32xf32>
    %291 = arith.mulf %284, %246 : vector<8x32xf32>
    %292 = arith.mulf %283, %289 : vector<8x32xf32>
    %293 = arith.addf %291, %292 : vector<8x32xf32>
    %294 = math.tanh %293 : vector<8x32xf32>
    %295 = arith.mulf %290, %294 : vector<8x32xf32>
    %296 = vector.extract_strided_slice %9 {offsets = [48, 0], sizes = [8, 128], strides = [1, 1]} : vector<64x128xf32> to vector<8x128xf32>
    %297 = arith.truncf %270 : vector<8x32xf32> to vector<8x32xbf16>
    %cst_71 = arith.constant dense<0.000000e+00> : vector<8x128xf32>
    %298 = tpu.matmul %297, %2, %cst_71 {dimension_numbers = #tpu.dot_dimension_numbers<[1], [0], [0], [1], [0, 0, 1, 1], [], []>} : vector<8x32xbf16>, vector<32x128xbf16>, vector<8x128xf32> -> vector<8x128xf32>
    %299 = arith.addf %296, %298 : vector<8x128xf32>
    %300 = arith.negf %299 : vector<8x128xf32>
    %301 = math.exp %300 : vector<8x128xf32>
    %cst_72 = arith.constant 1.000000e+00 : f32
    %302 = vector.broadcast %cst_72 : f32 to vector<8x128xf32>
    %303 = arith.addf %302, %301 : vector<8x128xf32>
    %304 = arith.divf %302, %303 : vector<8x128xf32>
    %305 = vector.extract_strided_slice %304 {offsets = [0, 0], sizes = [8, 32], strides = [1, 1]} : vector<8x128xf32> to vector<8x32xf32>
    %306 = vector.extract_strided_slice %304 {offsets = [0, 32], sizes = [8, 32], strides = [1, 1]} : vector<8x128xf32> to vector<8x32xf32>
    %307 = vector.extract_strided_slice %304 {offsets = [0, 64], sizes = [8, 32], strides = [1, 1]} : vector<8x128xf32> to vector<8x32xf32>
    %cst_73 = arith.constant 2.000000e+00 : f32
    %308 = vector.broadcast %cst_73 : f32 to vector<8x32xf32>
    %309 = arith.mulf %308, %307 : vector<8x32xf32>
    %cst_74 = arith.constant 1.000000e+00 : f32
    %310 = vector.broadcast %cst_74 : f32 to vector<8x32xf32>
    %311 = arith.subf %309, %310 : vector<8x32xf32>
    %312 = vector.extract_strided_slice %304 {offsets = [0, 96], sizes = [8, 32], strides = [1, 1]} : vector<8x128xf32> to vector<8x32xf32>
    %313 = arith.mulf %306, %268 : vector<8x32xf32>
    %314 = arith.mulf %305, %311 : vector<8x32xf32>
    %315 = arith.addf %313, %314 : vector<8x32xf32>
    %316 = math.tanh %315 : vector<8x32xf32>
    %317 = arith.mulf %312, %316 : vector<8x32xf32>
    %318 = arith.truncf %295 : vector<8x32xf32> to vector<8x32xbf16>
    %cst_75 = arith.constant dense<0.000000e+00> : vector<8x128xf32>
    %319 = tpu.matmul %318, %3, %cst_75 {dimension_numbers = #tpu.dot_dimension_numbers<[1], [0], [0], [1], [0, 0, 1, 1], [], []>} : vector<8x32xbf16>, vector<32x128xbf16>, vector<8x128xf32> -> vector<8x128xf32>
    %320 = arith.truncf %317 : vector<8x32xf32> to vector<8x32xbf16>
    %cst_76 = arith.constant dense<0.000000e+00> : vector<8x128xf32>
    %321 = tpu.matmul %320, %1, %cst_76 {dimension_numbers = #tpu.dot_dimension_numbers<[1], [0], [0], [1], [0, 0, 1, 1], [], []>} : vector<8x32xbf16>, vector<32x128xbf16>, vector<8x128xf32> -> vector<8x128xf32>
    %322 = arith.addf %319, %321 : vector<8x128xf32>
    %323 = vector.broadcast %5 : vector<1x128xf32> to vector<8x128xf32>
    %324 = arith.addf %322, %323 : vector<8x128xf32>
    %325 = arith.negf %324 : vector<8x128xf32>
    %326 = math.exp %325 : vector<8x128xf32>
    %cst_77 = arith.constant 1.000000e+00 : f32
    %327 = vector.broadcast %cst_77 : f32 to vector<8x128xf32>
    %328 = arith.addf %327, %326 : vector<8x128xf32>
    %329 = arith.divf %327, %328 : vector<8x128xf32>
    %330 = vector.extract_strided_slice %329 {offsets = [0, 0], sizes = [8, 32], strides = [1, 1]} : vector<8x128xf32> to vector<8x32xf32>
    %331 = vector.extract_strided_slice %329 {offsets = [0, 32], sizes = [8, 32], strides = [1, 1]} : vector<8x128xf32> to vector<8x32xf32>
    %332 = vector.extract_strided_slice %329 {offsets = [0, 64], sizes = [8, 32], strides = [1, 1]} : vector<8x128xf32> to vector<8x32xf32>
    %cst_78 = arith.constant 2.000000e+00 : f32
    %333 = vector.broadcast %cst_78 : f32 to vector<8x32xf32>
    %334 = arith.mulf %333, %332 : vector<8x32xf32>
    %cst_79 = arith.constant 1.000000e+00 : f32
    %335 = vector.broadcast %cst_79 : f32 to vector<8x32xf32>
    %336 = arith.subf %334, %335 : vector<8x32xf32>
    %337 = vector.extract_strided_slice %329 {offsets = [0, 96], sizes = [8, 32], strides = [1, 1]} : vector<8x128xf32> to vector<8x32xf32>
    %338 = arith.mulf %331, %293 : vector<8x32xf32>
    %339 = arith.mulf %330, %336 : vector<8x32xf32>
    %340 = arith.addf %338, %339 : vector<8x32xf32>
    %341 = math.tanh %340 : vector<8x32xf32>
    %342 = arith.mulf %337, %341 : vector<8x32xf32>
    %343 = vector.extract_strided_slice %9 {offsets = [56, 0], sizes = [8, 128], strides = [1, 1]} : vector<64x128xf32> to vector<8x128xf32>
    %344 = arith.truncf %317 : vector<8x32xf32> to vector<8x32xbf16>
    %cst_80 = arith.constant dense<0.000000e+00> : vector<8x128xf32>
    %345 = tpu.matmul %344, %2, %cst_80 {dimension_numbers = #tpu.dot_dimension_numbers<[1], [0], [0], [1], [0, 0, 1, 1], [], []>} : vector<8x32xbf16>, vector<32x128xbf16>, vector<8x128xf32> -> vector<8x128xf32>
    %346 = arith.addf %343, %345 : vector<8x128xf32>
    %347 = arith.negf %346 : vector<8x128xf32>
    %348 = math.exp %347 : vector<8x128xf32>
    %cst_81 = arith.constant 1.000000e+00 : f32
    %349 = vector.broadcast %cst_81 : f32 to vector<8x128xf32>
    %350 = arith.addf %349, %348 : vector<8x128xf32>
    %351 = arith.divf %349, %350 : vector<8x128xf32>
    %352 = vector.extract_strided_slice %351 {offsets = [0, 0], sizes = [8, 32], strides = [1, 1]} : vector<8x128xf32> to vector<8x32xf32>
    %353 = vector.extract_strided_slice %351 {offsets = [0, 32], sizes = [8, 32], strides = [1, 1]} : vector<8x128xf32> to vector<8x32xf32>
    %354 = vector.extract_strided_slice %351 {offsets = [0, 64], sizes = [8, 32], strides = [1, 1]} : vector<8x128xf32> to vector<8x32xf32>
    %cst_82 = arith.constant 2.000000e+00 : f32
    %355 = vector.broadcast %cst_82 : f32 to vector<8x32xf32>
    %356 = arith.mulf %355, %354 : vector<8x32xf32>
    %cst_83 = arith.constant 1.000000e+00 : f32
    %357 = vector.broadcast %cst_83 : f32 to vector<8x32xf32>
    %358 = arith.subf %356, %357 : vector<8x32xf32>
    %359 = vector.extract_strided_slice %351 {offsets = [0, 96], sizes = [8, 32], strides = [1, 1]} : vector<8x128xf32> to vector<8x32xf32>
    %360 = arith.mulf %353, %315 : vector<8x32xf32>
    %361 = arith.mulf %352, %358 : vector<8x32xf32>
    %362 = arith.addf %360, %361 : vector<8x32xf32>
    %363 = math.tanh %362 : vector<8x32xf32>
    %364 = arith.mulf %359, %363 : vector<8x32xf32>
    %365 = arith.truncf %342 : vector<8x32xf32> to vector<8x32xbf16>
    %cst_84 = arith.constant dense<0.000000e+00> : vector<8x128xf32>
    %366 = tpu.matmul %365, %3, %cst_84 {dimension_numbers = #tpu.dot_dimension_numbers<[1], [0], [0], [1], [0, 0, 1, 1], [], []>} : vector<8x32xbf16>, vector<32x128xbf16>, vector<8x128xf32> -> vector<8x128xf32>
    %367 = arith.truncf %364 : vector<8x32xf32> to vector<8x32xbf16>
    %cst_85 = arith.constant dense<0.000000e+00> : vector<8x128xf32>
    %368 = tpu.matmul %367, %1, %cst_85 {dimension_numbers = #tpu.dot_dimension_numbers<[1], [0], [0], [1], [0, 0, 1, 1], [], []>} : vector<8x32xbf16>, vector<32x128xbf16>, vector<8x128xf32> -> vector<8x128xf32>
    %369 = arith.addf %366, %368 : vector<8x128xf32>
    %370 = vector.broadcast %5 : vector<1x128xf32> to vector<8x128xf32>
    %371 = arith.addf %369, %370 : vector<8x128xf32>
    %372 = arith.negf %371 : vector<8x128xf32>
    %373 = math.exp %372 : vector<8x128xf32>
    %cst_86 = arith.constant 1.000000e+00 : f32
    %374 = vector.broadcast %cst_86 : f32 to vector<8x128xf32>
    %375 = arith.addf %374, %373 : vector<8x128xf32>
    %376 = arith.divf %374, %375 : vector<8x128xf32>
    %377 = vector.extract_strided_slice %376 {offsets = [0, 0], sizes = [8, 32], strides = [1, 1]} : vector<8x128xf32> to vector<8x32xf32>
    %378 = vector.extract_strided_slice %376 {offsets = [0, 32], sizes = [8, 32], strides = [1, 1]} : vector<8x128xf32> to vector<8x32xf32>
    %379 = vector.extract_strided_slice %376 {offsets = [0, 64], sizes = [8, 32], strides = [1, 1]} : vector<8x128xf32> to vector<8x32xf32>
    %cst_87 = arith.constant 2.000000e+00 : f32
    %380 = vector.broadcast %cst_87 : f32 to vector<8x32xf32>
    %381 = arith.mulf %380, %379 : vector<8x32xf32>
    %cst_88 = arith.constant 1.000000e+00 : f32
    %382 = vector.broadcast %cst_88 : f32 to vector<8x32xf32>
    %383 = arith.subf %381, %382 : vector<8x32xf32>
    %384 = vector.extract_strided_slice %376 {offsets = [0, 96], sizes = [8, 32], strides = [1, 1]} : vector<8x128xf32> to vector<8x32xf32>
    %385 = arith.mulf %378, %340 : vector<8x32xf32>
    %386 = arith.mulf %377, %383 : vector<8x32xf32>
    %387 = arith.addf %385, %386 : vector<8x32xf32>
    %388 = math.tanh %387 : vector<8x32xf32>
    %389 = arith.mulf %384, %388 : vector<8x32xf32>
    %c0_89 = arith.constant 0 : index
    %c0_90 = arith.constant 0 : index
    %390 = vector.load %arg8[%c0_89, %c0_90] : memref<32x1xf32, #tpu.memory_space<vmem>>, vector<32x1xf32>
    %cst_91 = arith.constant dense<0.000000e+00> : vector<8x1xf32>
    %391 = tpu.matmul %389, %390, %cst_91 {dimension_numbers = #tpu.dot_dimension_numbers<[1], [0], [0], [1], [0, 0, 1, 1], [], []>} : vector<8x32xf32>, vector<32x1xf32>, vector<8x1xf32> -> vector<8x1xf32>
    %c0_92 = arith.constant 0 : index
    %c0_93 = arith.constant 0 : index
    %392 = vector.load %arg9[%c0_92, %c0_93] : memref<1x1xf32, #tpu.memory_space<vmem>>, vector<1x1xf32>
    %393 = vector.broadcast %392 : vector<1x1xf32> to vector<8x1xf32>
    %394 = arith.addf %391, %393 : vector<8x1xf32>
    %c0_94 = arith.constant 0 : index
    %c0_95 = arith.constant 0 : index
    %395 = vector.load %arg10[%c0_94, %c0_95] : memref<8x1xf32, #tpu.memory_space<vmem>>, vector<8x1xf32>
    tpu.vector_store %arg10[%c0_94, %c0_95], %394 {strides = array<i32>} : memref<8x1xf32, #tpu.memory_space<vmem>>, vector<8x1xf32>,
    return
  }
  func.func @transform_0(%arg0: i32) -> (i32, i32) {
    %c0_i32 = arith.constant 0 : i32
    %c0_i32_0 = arith.constant 0 : i32
    %c0_i32_1 = arith.constant 0 : i32
    return %c0_i32, %c0_i32_0 : i32, i32
  }
  func.func @transform_1(%arg0: i32) -> (i32, i32) {
    %c0_i32 = arith.constant 0 : i32
    %c0_i32_0 = arith.constant 0 : i32
    %c0_i32_1 = arith.constant 0 : i32
    return %c0_i32, %c0_i32_0 : i32, i32
  }
  func.func @transform_2(%arg0: i32) -> (i32, i32) {
    %c0_i32 = arith.constant 0 : i32
    %c0_i32_0 = arith.constant 0 : i32
    %c0_i32_1 = arith.constant 0 : i32
    return %c0_i32, %c0_i32_0 : i32, i32
  }
  func.func @transform_3(%arg0: i32) -> (i32, i32) {
    %c0_i32 = arith.constant 0 : i32
    %c0_i32_0 = arith.constant 0 : i32
    %c0_i32_1 = arith.constant 0 : i32
    return %c0_i32, %c0_i32_0 : i32, i32
  }
  func.func @transform_4(%arg0: i32) -> (i32, i32) {
    %c0_i32 = arith.constant 0 : i32
    %c0_i32_0 = arith.constant 0 : i32
    %c0_i32_1 = arith.constant 0 : i32
    return %c0_i32, %c0_i32_0 : i32, i32
  }
  func.func @transform_5(%arg0: i32) -> (i32, i32) {
    %c0_i32 = arith.constant 0 : i32
    %c0_i32_0 = arith.constant 0 : i32
    %c0_i32_1 = arith.constant 0 : i32
    return %c0_i32, %c0_i32_0 : i32, i32
  }
  func.func @transform_6(%arg0: i32) -> (i32, i32) {
    %c0_i32 = arith.constant 0 : i32
    %c0_i32_0 = arith.constant 0 : i32
    %c0_i32_1 = arith.constant 0 : i32
    return %c0_i32, %c0_i32_0 : i32, i32
  }
  func.func @transform_7(%arg0: i32) -> (i32, i32) {
    %c0_i32 = arith.constant 0 : i32
    %c0_i32_0 = arith.constant 0 : i32
    %c0_i32_1 = arith.constant 0 : i32
    return %c0_i32, %c0_i32_0 : i32, i32
  }
  func.func @transform_8(%arg0: i32) -> (i32, i32) {
    %c0_i32 = arith.constant 0 : i32
    %c0_i32_0 = arith.constant 0 : i32
    %c0_i32_1 = arith.constant 0 : i32
    return %c0_i32, %c0_i32_0 : i32, i32
  }
  func.func @transform_9(%arg0: i32) -> (i32, i32) {
    %c0_i32 = arith.constant 0 : i32
    %c0_i32_0 = arith.constant 0 : i32
    %c0_i32_1 = arith.constant 0 : i32
    return %c0_i32, %c0_i32_0 : i32, i32
  }
}

</mosaic_0001>

<bundles_post_ra>
// kernel: tpu_custom_call.1
= control target key start
LH: loop header
LB: loop body
LE: loop exit
PB: predicated region body
PF: predicated region fallthrough
CT: control target
= control target key end

     0   :  { %vm88_vm0 = vcmask 130048   ;;  %v1471_v4 = vmov 0   ;;  %s1472_s17 = smov 64   ;;  %s1473_s18 = smov 32   ;;  %vm142_vm5 = vcmask 261120   ;;  %s1819_s1 = inlined_call_operand.vmem [shape: bf16[16,128], index: 1, kind: input, shape index: {}]   ;;  %s1820_s2 = inlined_call_operand.vmem [shape: bf16[32,128], index: 2, kind: input, shape index: {}]   ;;  %s1821_s0 = inlined_call_operand.vmem [shape: bf16[64,16], index: 0, kind: input, shape index: {}]   ;;  %s1822_s3 = inlined_call_operand.vmem [shape: f32[1,128], index: 3, kind: input, shape index: {}]   ;;  %s1823_s5 = inlined_call_operand.vmem [shape: bf16[32,128], index: 5, kind: input, shape index: {}]   ;;  %s1824_s4 = inlined_call_operand.vmem [shape: bf16[32,128], index: 4, kind: input, shape index: {}]   ;;  %s1825_s6 = inlined_call_operand.vmem [shape: f32[1,128], index: 6, kind: input, shape index: {}]   ;;  %s1826_s7 = inlined_call_operand.vmem [shape: f32[32,1], index: 7, kind: input, shape index: {}]   ;;  %s1827_s8 = inlined_call_operand.<no memory space> [shape: f32[1,1], index: 8, kind: input, shape index: {}]   ;;  %s1828_s9 = inlined_call_operand.vmem [shape: f32[8,1], index: 9, kind: output, shape index: {}]  }
   0x1   :  { %v1356_v0 = vld [vmem:[%s1819_s1] sm:$0xff]  ;;  %v1530_v1 = vld [vmem:[%s1820_s2 + $0x8] sm:$0xff] }
   0x2   :  { %v1363_v2 = vld [vmem:[%s1821_s0] sm:$0xff]  ;;  %108 = vmatpush.bf16.msra.mxu0 %v1356_v0  ;;  %152 = vmatpush.bf16.msra.mxu1 %v1530_v1  ;;  %v1564_v32 = vld [vmem:[%s1823_s5 + $0x8] sm:$0xff] }
   0x3   :  { %v1539_v3 = vld [vmem:[%s1820_s2] sm:$0xff]  ;;  %v1569_v33 = vld [vmem:[%s1824_s4 + $0x8] sm:$0xff]  ;;  %248 = vmatpush.bf16.msra.mxu3 %v1564_v32 }
   0x4   :  { %v1552_v5 = vld [vmem:[%s1822_s3] ss:$0 sm:$0xff]  ;;  %223 = vmatpush.bf16.msra.mxu2 %v1569_v33 }
   0x5   :  { %1273 = vmatmul.msk.bf16.vlgmr.msra.gmra.mxu0 %vm88_vm0, %v1363_v2  ;;  %v1575_v34 = vld [vmem:[%s1823_s5] sm:$0xff] }
   0x6   :  { %696 = vmatpush.bf16.msrb.mxu0 %v1530_v1  ;;  %153 = vmatpush.bf16.msra.mxu1 %v1539_v3  ;;  %v1581_v35 = vld [vmem:[%s1824_s4] sm:$0xff] }
   0x7   :  { %249 = vmatpush.bf16.msra.mxu3 %v1575_v34  ;;  %v1604_v47 = vld [vmem:[%s1825_s6] ss:$0 sm:$0xff] }
   0x8   :  { %224 = vmatpush.bf16.msra.mxu2 %v1581_v35 }
   0x9   :  { %154 = vmatmul.bf16.vlgmr.msra.gmra.mxu1 %v1471_v4 }
   0xa   :  { %303 = vmatpush.bf16.msrb.mxu1 %v1530_v1  ;;  %697 = vmatpush.bf16.msrb.mxu0 %v1539_v3 }
   0xb   :  { %382 = vmatpush.bf16.msrb.mxu3 %v1564_v32 }
   0xc   :  { %363 = vmatpush.bf16.msrb.mxu2 %v1569_v33  ;;  %250 = vmatmul.bf16.vlgmr.msra.gmra.mxu3 %v1471_v4 }
   0xe   :  { %304 = vmatpush.bf16.msrb.mxu1 %v1539_v3  ;;  %887 = vmatpush.bf16.msra.mxu0 %v1569_v33 }
   0xf   :  { %383 = vmatpush.bf16.msrb.mxu3 %v1575_v34 }
  0x10   :  { %364 = vmatpush.bf16.msrb.mxu2 %v1581_v35 }
  0x12   :  { %434 = vmatpush.bf16.msra.mxu1 %v1530_v1  ;;  %888 = vmatpush.bf16.msra.mxu0 %v1581_v35 }
  0x13   :  { %513 = vmatpush.bf16.msra.mxu3 %v1564_v32 }
  0x16   :  { %435 = vmatpush.bf16.msra.mxu1 %v1539_v3 }
  0x17   :  { %514 = vmatpush.bf16.msra.mxu3 %v1575_v34 }
  0x82   :  { %v110_v6 = vpop.f32.mrf.mxu0 }
  0x83   :  { %v111_v7 = vadd.f32 %v1552_v5, %v110_v6 }
  0x86   :  { %v155_v8 = vpop.f32.mrf.mxu1 }
  0x87   :  { %v159_v9 = vadd.f32 %v155_v8, %v111_v7 }
  0x89   :  { %v1285_v10 = vmul.f32 -1.442695, %v159_v9 }
  0x8a   :  { %v112_v42 = vpop.f32.mrf.mxu0 }
  0x8b   :  { %1373 = vpow2.f32 %v1285_v10  ;;  %v113_v43 = vadd.f32 %v1552_v5, %v112_v42 }
  0x8e   :  { %v157_v11 = vpop.f32.mrf.mxu1 }
  0x8f   :  { %v251_v39 = vpop.f32.mrf.mxu3 }
  0x91   :  { %v1374_v12 = vpop.eup %1373 }
  0x92   :  { %v163_v13 = vadd.f32 1.0, %v1374_v12 }
  0x94   :  { %1375 = vrcp.f32 %v163_v13  ;;  %v175_v17 = vand.u32 2147483648, %v163_v13  ;;  %v173_v19 = vand.u32 2147483647, %v163_v13  ;;  %vm169_vm2 = vweird.f32 %v163_v13 }
  0x96   :  { %v176_v21 = vor.u32 1.1754944e-38, %v175_v17  ;;  %vm174_vm4 = vcmp.eq.f32.partialorder %v173_v19, 8.507059e+37 }
  0x97   :  { %v253_v41 = vpop.f32.mrf.mxu3 }
  0x9a   :  { %v1376_v14 = vpop.eup %1375 }
  0x9b   :  { %v165_v15 = vmul.f32 %v1376_v14, %v163_v13  ;;  %vm170_vm1 = vweird.f32 %v1376_v14 }
  0x9c   :  { %vm171_vm3 = vmor %vm169_vm2, %vm170_vm1 }
  0x9d   :  { %v166_v16 = vsub.f32 1.0, %v165_v15 }
  0x9f   :  { %v167_v18 = vmul.f32 %v1376_v14, %v166_v16 }
  0xa1   :  { %v168_v20 = vadd.f32 %v1376_v14, %v167_v18 }
  0xa3   :  { %v172_v22 = vsel %vm171_vm3, %v1376_v14, %v168_v20 }
  0xa4   :  { %v177_v23 = vsel %vm174_vm4, %v176_v21, %v172_v22 }
  0xa5   :  { %v179_v24 = vmul.f32 2.0, %v177_v23  ;;  %v181_v28 = vmul.f32 0.0, %v177_v23 }
  0xa7   :  { %v1286_v25 = vadd.f32 -1.0, %v179_v24 }
  0xa9   :  { %183 = vrot.lane.b32.xlu0 %v1286_v25, %s1472_s17 }
 0x11b   :  { %v184_v26 = vpop.permute.xlu0 %183 }
 0x11c   :  { %v186_v27 = vmul.f32 %v184_v26, %v177_v23 }
 0x11e   :  { %188 = vrot.lane.b32.xlu0 %v186_v27, %s1473_s18 }
 0x190   :  { %v189_v29 = vpop.permute.xlu0 %188 }
 0x191   :  { %v1557_v30 = vadd.f32 %v189_v29, %v181_v28 }
 0x193   :  { %1377 = vtanh.f32 %v1557_v30 }
 0x199   :  { %v1378_v31 = vpop.eup %1377 }
 0x19a   :  { %194 = vrot.lane.b32.xlu1 %v1378_v31, %s1472_s17 }
 0x20c   :  { %v195_v36 = vpop.permute.xlu1 %194 }
 0x20d   :  { %v197_v37 = vmul.f32 %v195_v36, %v177_v23 }
 0x20f   :  { %v198_v38 = vpack.c.bf16 %v197_v37, %v197_v37 }
 0x211   :  { %200 = vrot.lane.b32.xlu1 %v198_v38, %s1473_s18 }
 0x283   :  { %v201_v40 = vpop.permute.xlu1 %200 }
 0x284   :  { %1295 = vmatmul.msk.bf16.vlgmr.msra.gmra.mxu2 %vm142_vm5, %v201_v40  ;;  %1306 = vmatmul.msk.bf16.vlgmr.msrb.gmra.mxu1 %vm142_vm5, %v201_v40 }
 0x285   :  { %494 = vmatpush.bf16.msra.mxu2 %v1569_v33  ;;  %565 = vmatpush.bf16.msrb.mxu1 %v1530_v1 }
 0x289   :  { %495 = vmatpush.bf16.msra.mxu2 %v1581_v35  ;;  %566 = vmatpush.bf16.msrb.mxu1 %v1539_v3 }
 0x301   :  { %v306_v44 = vpop.f32.mrf.mxu1 }
 0x302   :  { %v310_v45 = vadd.f32 %v306_v44, %v113_v43 }
 0x304   :  { %v1307_v46 = vmul.f32 -1.442695, %v310_v45 }
 0x306   :  { %1379 = vpow2.f32 %v1307_v46 }
 0x307   :  { %v226_v48 = vpop.f32.mrf.mxu2 }
 0x308   :  { %v252_v49 = vadd.f32 %v251_v39, %v226_v48 }
 0x309   :  { %v308_v50 = vpop.f32.mrf.mxu1 }
 0x30a   :  { %v258_v51 = vadd.f32 %v1604_v47, %v252_v49 }
 0x30c   :  { %v1380_v52 = vpop.eup %1379  ;;  %v1304_v53 = vmul.f32 -1.442695, %v258_v51 }
 0x30d   :  { %v314_v54 = vadd.f32 1.0, %v1380_v52 }
 0x30e   :  { %1381 = vpow2.f32 %v1304_v53 }
 0x30f   :  { %1383 = vrcp.f32 %v314_v54  ;;  %v228_v55 = vpop.f32.mrf.mxu2  ;;  %v326_v10 = vand.u32 2147483648, %v314_v54  ;;  %vm320_vm11 = vweird.f32 %v314_v54  ;;  %v324_v12 = vand.u32 2147483647, %v314_v54 }
 0x311   :  { %v327_v16 = vor.u32 1.1754944e-38, %v326_v10  ;;  %vm325_vm13 = vcmp.eq.f32.partialorder %v324_v12, 8.507059e+37 }
 0x314   :  { %v1382_v56 = vpop.eup %1381 }
 0x315   :  { %v1384_v57 = vpop.eup %1383  ;;  %v262_v58 = vadd.f32 1.0, %v1382_v56 }
 0x316   :  { %v316_v59 = vmul.f32 %v1384_v57, %v314_v54  ;;  %vm321_vm8 = vweird.f32 %v1384_v57 }
 0x317   :  { %1385 = vrcp.f32 %v262_v58  ;;  %v274_v2 = vand.u32 2147483648, %v262_v58  ;;  %v272_v6 = vand.u32 2147483647, %v262_v58  ;;  %vm268_vm7 = vweird.f32 %v262_v58  ;;  %vm322_vm12 = vmor %vm320_vm11, %vm321_vm8 }
 0x318   :  { %v317_v60 = vsub.f32 1.0, %v316_v59 }
 0x319   :  { %v275_v9 = vor.u32 1.1754944e-38, %v274_v2  ;;  %vm273_vm10 = vcmp.eq.f32.partialorder %v272_v6, 8.507059e+37 }
 0x31a   :  { %v318_v0 = vmul.f32 %v1384_v57, %v317_v60 }
 0x31c   :  { %v319_v8 = vadd.f32 %v1384_v57, %v318_v0 }
 0x31d   :  { %v1386_v61 = vpop.eup %1385 }
 0x31e   :  { %v264_v62 = vmul.f32 %v1386_v61, %v262_v58  ;;  %vm269_vm6 = vweird.f32 %v1386_v61  ;;  %v323_v15 = vsel %vm322_vm12, %v1384_v57, %v319_v8 }
 0x31f   :  { %vm270_vm9 = vmor %vm268_vm7, %vm269_vm6  ;;  %v328_v18 = vsel %vm325_vm13, %v327_v16, %v323_v15 }
 0x320   :  { %v265_v63 = vsub.f32 1.0, %v264_v62  ;;  %v330_v19 = vmul.f32 2.0, %v328_v18  ;;  %v332_v28 = vmul.f32 %v328_v18, %v1557_v30  ;;  %v1364_v30 = vld [vmem:[%s1821_s0 + $0x8] sm:$0xff] }
 0x321   :  { %1274 = vmatmul.msk.bf16.gmra.mxu0 %vm88_vm0, %v1364_v30 }
 0x322   :  { %v266_v4 = vmul.f32 %v1386_v61, %v265_v63  ;;  %v1308_v20 = vadd.f32 -1.0, %v330_v19 }
 0x324   :  { %v267_v7 = vadd.f32 %v1386_v61, %v266_v4 }
 0x326   :  { %v271_v11 = vsel %vm270_vm9, %v1386_v61, %v267_v7 }
 0x327   :  { %v276_v13 = vsel %vm273_vm10, %v275_v9, %v271_v11 }
 0x328   :  { %v278_v14 = vmul.f32 2.0, %v276_v13  ;;  %v280_v25 = vmul.f32 0.0, %v276_v13 }
 0x32a   :  { %v1305_v17 = vadd.f32 -1.0, %v278_v14 }
 0x32c   :  { %282 = vrot.lane.b32.xlu2 %v1305_v17, %s1472_s17 }
 0x334   :  { %334 = vrot.lane.b32.xlu2 %v1308_v20, %s1472_s17 }
 0x386   :  { %v283_v21 = vpop.permute.xlu2 %282 }
 0x387   :  { %v285_v22 = vmul.f32 %v283_v21, %v276_v13 }
 0x389   :  { %287 = vrot.lane.b32.xlu0 %v285_v22, %s1473_s18 }
 0x38e   :  { %v335_v23 = vpop.permute.xlu2 %334 }
 0x38f   :  { %v337_v24 = vmul.f32 %v335_v23, %v328_v18 }
 0x391   :  { %339 = vrot.lane.b32.xlu1 %v337_v24, %s1473_s18 }
 0x39e   :  { %v115_v49 = vpop.f32.mrf.mxu0 }
 0x39f   :  { %v116_v50 = vadd.f32 %v1552_v5, %v115_v49 }
 0x3fb   :  { %v288_v26 = vpop.permute.xlu0 %287 }
 0x3fc   :  { %v1611_v27 = vadd.f32 %v288_v26, %v280_v25 }
 0x3fe   :  { %1387 = vtanh.f32 %v1611_v27 }
 0x403   :  { %v340_v29 = vpop.permute.xlu1 %339 }
 0x404   :  { %v1388_v31 = vpop.eup %1387  ;;  %v1615_v36 = vadd.f32 %v340_v29, %v332_v28 }
 0x405   :  { %293 = vrot.lane.b32.xlu2 %v1388_v31, %s1472_s17 }
 0x406   :  { %1389 = vtanh.f32 %v1615_v36 }
 0x40c   :  { %v1390_v37 = vpop.eup %1389 }
 0x40d   :  { %345 = vrot.lane.b32.xlu0 %v1390_v37, %s1472_s17 }
 0x45f   :  { %v294_v38 = vpop.permute.xlu2 %293 }
 0x460   :  { %v296_v39 = vmul.f32 %v294_v38, %v276_v13 }
 0x462   :  { %v349_v40 = vpack.c.bf16 %v296_v39, %v296_v39 }
 0x464   :  { %371 = vrot.lane.b32.xlu2 %v349_v40, %s1473_s18 }
 0x47f   :  { %v346_v41 = vpop.permute.xlu0 %345 }
 0x480   :  { %v348_v42 = vmul.f32 %v346_v41, %v328_v18 }
 0x482   :  { %v350_v43 = vpack.c.bf16 %v348_v42, %v348_v42 }
 0x484   :  { %352 = vrot.lane.b32.xlu1 %v350_v43, %s1473_s18 }
 0x4be   :  { %v372_v44 = vpop.permute.xlu2 %371 }
 0x4bf   :  { %1310 = vmatmul.msk.bf16.vlgmr.msrb.gmra.mxu3 %vm142_vm5, %v372_v44 }
 0x4c0   :  { %644 = vmatpush.bf16.msrb.mxu3 %v1564_v32 }
 0x4c4   :  { %645 = vmatpush.bf16.msrb.mxu3 %v1575_v34 }
 0x4f6   :  { %v353_v45 = vpop.permute.xlu1 %352 }
 0x4f7   :  { %1309 = vmatmul.msk.bf16.vlgmr.msrb.gmra.mxu2 %vm142_vm5, %v353_v45  ;;  %1313 = vmatmul.msk.bf16.vlgmr.msra.gmra.mxu1 %vm142_vm5, %v353_v45 }
 0x4f8   :  { %625 = vmatpush.bf16.msrb.mxu2 %v1569_v33  ;;  %756 = vmatpush.bf16.msra.mxu1 %v1569_v33 }
 0x4fc   :  { %626 = vmatpush.bf16.msrb.mxu2 %v1581_v35  ;;  %757 = vmatpush.bf16.msra.mxu1 %v1581_v35 }
 0x542   :  { %v385_v46 = vpop.f32.mrf.mxu3 }
 0x54a   :  { %v387_v48 = vpop.f32.mrf.mxu3 }
 0x574   :  { %v437_v51 = vpop.f32.mrf.mxu1 }
 0x575   :  { %v441_v52 = vadd.f32 %v437_v51, %v116_v50 }
 0x577   :  { %v1314_v53 = vmul.f32 -1.442695, %v441_v52  ;;  %v117_v52 = vpop.f32.mrf.mxu0 }
 0x579   :  { %1391 = vpow2.f32 %v1314_v53  ;;  %v118_v53 = vadd.f32 %v1552_v5, %v117_v52 }
 0x57a   :  { %v366_v54 = vpop.f32.mrf.mxu2 }
 0x57b   :  { %v386_v55 = vadd.f32 %v385_v46, %v366_v54 }
 0x57c   :  { %v439_v56 = vpop.f32.mrf.mxu1 }
 0x57d   :  { %v389_v57 = vadd.f32 %v1604_v47, %v386_v55 }
 0x57f   :  { %v1392_v58 = vpop.eup %1391  ;;  %v1311_v59 = vmul.f32 -1.442695, %v389_v57 }
 0x580   :  { %v445_v60 = vadd.f32 1.0, %v1392_v58 }
 0x581   :  { %1393 = vpow2.f32 %v1311_v59 }
 0x582   :  { %1395 = vrcp.f32 %v445_v60  ;;  %v368_v61 = vpop.f32.mrf.mxu2  ;;  %v457_v6 = vand.u32 2147483648, %v445_v60  ;;  %v455_v8 = vand.u32 2147483647, %v445_v60  ;;  %vm451_vm15 = vweird.f32 %v445_v60 }
 0x584   :  { %v458_v11 = vor.u32 1.1754944e-38, %v457_v6  ;;  %vm456_vm2 = vcmp.eq.f32.partialorder %v455_v8, 8.507059e+37 }
 0x587   :  { %v1394_v62 = vpop.eup %1393 }
 0x588   :  { %v1396_v63 = vpop.eup %1395  ;;  %v393_v0 = vadd.f32 1.0, %v1394_v62 }
 0x589   :  { %v447_v2 = vmul.f32 %v1396_v63, %v445_v60  ;;  %vm452_vm14 = vweird.f32 %v1396_v63 }
 0x58a   :  { %1397 = vrcp.f32 %v393_v0  ;;  %vm453_vm1 = vmor %vm451_vm15, %vm452_vm14  ;;  %v405_v17 = vand.u32 2147483648, %v393_v0  ;;  %v403_v20 = vand.u32 2147483647, %v393_v0  ;;  %vm399_vm4 = vweird.f32 %v393_v0 }
 0x58b   :  { %v448_v4 = vsub.f32 1.0, %v447_v2 }
 0x58c   :  { %v406_v22 = vor.u32 1.1754944e-38, %v405_v17  ;;  %vm404_vm7 = vcmp.eq.f32.partialorder %v403_v20, 8.507059e+37 }
 0x58d   :  { %v449_v7 = vmul.f32 %v1396_v63, %v448_v4 }
 0x58f   :  { %v450_v9 = vadd.f32 %v1396_v63, %v449_v7 }
 0x590   :  { %v1398_v10 = vpop.eup %1397 }
 0x591   :  { %v395_v12 = vmul.f32 %v1398_v10, %v393_v0  ;;  %v454_v13 = vsel %vm453_vm1, %v1396_v63, %v450_v9  ;;  %vm400_vm3 = vweird.f32 %v1398_v10 }
 0x592   :  { %v459_v14 = vsel %vm456_vm2, %v458_v11, %v454_v13  ;;  %vm401_vm6 = vmor %vm399_vm4, %vm400_vm3 }
 0x593   :  { %v396_v15 = vsub.f32 1.0, %v395_v12  ;;  %v461_v16 = vmul.f32 2.0, %v459_v14  ;;  %v463_v42 = vmul.f32 %v459_v14, %v1615_v36 }
 0x595   :  { %v1315_v18 = vadd.f32 -1.0, %v461_v16  ;;  %v397_v19 = vmul.f32 %v1398_v10, %v396_v15 }
 0x597   :  { %465 = vrot.lane.b32.xlu1 %v1315_v18, %s1472_s17  ;;  %v398_v21 = vadd.f32 %v1398_v10, %v397_v19 }
 0x599   :  { %v402_v23 = vsel %vm401_vm6, %v1398_v10, %v398_v21 }
 0x59a   :  { %v407_v24 = vsel %vm404_vm7, %v406_v22, %v402_v23 }
 0x59b   :  { %v409_v25 = vmul.f32 2.0, %v407_v24  ;;  %v411_v38 = vmul.f32 %v407_v24, %v1611_v27 }
 0x59d   :  { %v1312_v26 = vadd.f32 -1.0, %v409_v25 }
 0x59f   :  { %413 = vrot.lane.b32.xlu0 %v1312_v26, %s1472_s17 }
 0x609   :  { %v466_v28 = vpop.permute.xlu1 %465 }
 0x60a   :  { %v468_v29 = vmul.f32 %v466_v28, %v459_v14 }
 0x60c   :  { %470 = vrot.lane.b32.xlu0 %v468_v29, %s1473_s18 }
 0x611   :  { %v414_v31 = vpop.permute.xlu0 %413 }
 0x612   :  { %v416_v37 = vmul.f32 %v414_v31, %v407_v24 }
 0x614   :  { %418 = vrot.lane.b32.xlu2 %v416_v37, %s1473_s18 }
 0x66e   :  { %v419_v39 = vpop.permute.xlu2 %418 }
 0x66f   :  { %v1642_v40 = vadd.f32 %v419_v39, %v411_v38 }
 0x671   :  { %1399 = vtanh.f32 %v1642_v40 }
 0x677   :  { %v1400_v41 = vpop.eup %1399 }
 0x678   :  { %424 = vrot.lane.b32.xlu1 %v1400_v41, %s1472_s17 }
 0x67e   :  { %v471_v43 = vpop.permute.xlu0 %470 }
 0x67f   :  { %v1647_v30 = vadd.f32 %v471_v43, %v463_v42 }
 0x681   :  { %1401 = vtanh.f32 %v1647_v30 }
 0x687   :  { %v1402_v44 = vpop.eup %1401 }
 0x688   :  { %476 = vrot.lane.b32.xlu2 %v1402_v44, %s1472_s17 }
 0x6e2   :  { %v477_v45 = vpop.permute.xlu2 %476 }
 0x6e3   :  { %v479_v27 = vmul.f32 %v477_v45, %v459_v14 }
 0x6e5   :  { %v481_v46 = vpack.c.bf16 %v479_v27, %v479_v27 }
 0x6e7   :  { %483 = vrot.lane.b32.xlu0 %v481_v46, %s1473_s18 }
 0x6ea   :  { %v425_v48 = vpop.permute.xlu1 %424 }
 0x6eb   :  { %v427_v49 = vmul.f32 %v425_v48, %v407_v24 }
 0x6ed   :  { %v480_v50 = vpack.c.bf16 %v427_v49, %v427_v49 }
 0x6ef   :  { %502 = vrot.lane.b32.xlu1 %v480_v50, %s1473_s18 }
 0x759   :  { %v484_v51 = vpop.permute.xlu0 %483 }
 0x75a   :  { %1316 = vmatmul.msk.bf16.vlgmr.msra.gmra.mxu2 %vm142_vm5, %v484_v51  ;;  %1320 = vmatmul.msk.bf16.vlgmr.msrb.gmra.mxu1 %vm142_vm5, %v484_v51 }
 0x75b   :  { %775 = vmatpush.bf16.msra.mxu2 %v1564_v32  ;;  %906 = vmatpush.bf16.msrb.mxu1 %v1564_v32 }
 0x75f   :  { %776 = vmatpush.bf16.msra.mxu2 %v1575_v34  ;;  %907 = vmatpush.bf16.msrb.mxu1 %v1575_v34 }
 0x761   :  { %v503_v36 = vpop.permute.xlu1 %502 }
 0x762   :  { %1317 = vmatmul.msk.bf16.vlgmr.msra.gmra.mxu3 %vm142_vm5, %v503_v36 }
 0x763   :  { %827 = vmatpush.bf16.msra.mxu3 %v1530_v1 }
 0x767   :  { %828 = vmatpush.bf16.msra.mxu3 %v1539_v3 }
 0x7d7   :  { %v568_v54 = vpop.f32.mrf.mxu1 }
 0x7d8   :  { %v572_v55 = vadd.f32 %v568_v54, %v118_v53 }
 0x7da   :  { %v1321_v56 = vmul.f32 -1.442695, %v572_v55 }
 0x7dc   :  { %1403 = vpow2.f32 %v1321_v56 }
 0x7dd   :  { %v497_v57 = vpop.f32.mrf.mxu2 }
 0x7df   :  { %v570_v58 = vpop.f32.mrf.mxu1 }
 0x7e2   :  { %v1404_v59 = vpop.eup %1403 }
 0x7e3   :  { %v576_v60 = vadd.f32 1.0, %v1404_v59 }
 0x7e5   :  { %1405 = vrcp.f32 %v576_v60  ;;  %v499_v61 = vpop.f32.mrf.mxu2  ;;  %v516_v62 = vpop.f32.mrf.mxu3  ;;  %v588_v9 = vand.u32 2147483648, %v576_v60  ;;  %v586_v11 = vand.u32 2147483647, %v576_v60  ;;  %vm582_vm9 = vweird.f32 %v576_v60 }
 0x7e6   :  { %v517_v63 = vadd.f32 %v516_v62, %v497_v57 }
 0x7e7   :  { %v589_v15 = vor.u32 1.1754944e-38, %v588_v9  ;;  %vm587_vm11 = vcmp.eq.f32.partialorder %v586_v11, 8.507059e+37 }
 0x7e8   :  { %v520_v0 = vadd.f32 %v1604_v47, %v517_v63 }
 0x7ea   :  { %v1318_v2 = vmul.f32 -1.442695, %v520_v0 }
 0x7eb   :  { %v1406_v4 = vpop.eup %1405 }
 0x7ec   :  { %v578_v6 = vmul.f32 %v1406_v4, %v576_v60  ;;  %1407 = vpow2.f32 %v1318_v2  ;;  %vm583_vm8 = vweird.f32 %v1406_v4 }
 0x7ed   :  { %v518_v7 = vpop.f32.mrf.mxu3  ;;  %vm584_vm10 = vmor %vm582_vm9, %vm583_vm8 }
 0x7ee   :  { %v579_v8 = vsub.f32 1.0, %v578_v6 }
 0x7f0   :  { %v580_v10 = vmul.f32 %v1406_v4, %v579_v8 }
 0x7f2   :  { %v1408_v12 = vpop.eup %1407  ;;  %v581_v13 = vadd.f32 %v1406_v4, %v580_v10 }
 0x7f3   :  { %v524_v14 = vadd.f32 1.0, %v1408_v12 }
 0x7f4   :  { %v585_v16 = vsel %vm584_vm10, %v1406_v4, %v581_v13 }
 0x7f5   :  { %1409 = vrcp.f32 %v524_v14  ;;  %v590_v17 = vsel %vm587_vm11, %v589_v15, %v585_v16  ;;  %v536_v23 = vand.u32 2147483648, %v524_v14  ;;  %v534_v25 = vand.u32 2147483647, %v524_v14 }
 0x7f6   :  { %v592_v18 = vmul.f32 2.0, %v590_v17  ;;  %vm530_vm13 = vweird.f32 %v524_v14  ;;  %v594_v44 = vmul.f32 %v590_v17, %v1647_v30  ;;  %v1365_v30 = vld [vmem:[%s1821_s0 + $0x10] sm:$0xff] }
 0x7f7   :  { %v537_v28 = vor.u32 1.1754944e-38, %v536_v23  ;;  %vm535_vm15 = vcmp.eq.f32.partialorder %v534_v25, 8.507059e+37  ;;  %1275 = vmatmul.msk.bf16.gmra.mxu0 %vm88_vm0, %v1365_v30 }
 0x7f8   :  { %v1322_v19 = vadd.f32 -1.0, %v592_v18 }
 0x7fa   :  { %596 = vrot.lane.b32.xlu0 %v1322_v19, %s1472_s17 }
 0x7fb   :  { %v1410_v20 = vpop.eup %1409 }
 0x7fc   :  { %v526_v21 = vmul.f32 %v1410_v20, %v524_v14  ;;  %vm531_vm12 = vweird.f32 %v1410_v20 }
 0x7fd   :  { %vm532_vm14 = vmor %vm530_vm13, %vm531_vm12 }
 0x7fe   :  { %v527_v22 = vsub.f32 1.0, %v526_v21 }
 0x800   :  { %v528_v24 = vmul.f32 %v1410_v20, %v527_v22 }
 0x802   :  { %v529_v26 = vadd.f32 %v1410_v20, %v528_v24 }
 0x804   :  { %v533_v29 = vsel %vm532_vm14, %v1410_v20, %v529_v26 }
 0x805   :  { %v538_v31 = vsel %vm535_vm15, %v537_v28, %v533_v29 }
 0x806   :  { %v540_v37 = vmul.f32 2.0, %v538_v31  ;;  %v542_v48 = vmul.f32 %v538_v31, %v1642_v40  ;;  %v1366_v40 = vld [vmem:[%s1821_s0 + $0x18] sm:$0xff] }
 0x807   :  { %1276 = vmatmul.msk.bf16.gmra.mxu0 %vm88_vm0, %v1366_v40 }
 0x808   :  { %v1319_v38 = vadd.f32 -1.0, %v540_v37 }
 0x80a   :  { %544 = vrot.lane.b32.xlu2 %v1319_v38, %s1472_s17 }
 0x864   :  { %v545_v39 = vpop.permute.xlu2 %544 }
 0x865   :  { %v547_v41 = vmul.f32 %v545_v39, %v538_v31 }
 0x867   :  { %549 = vrot.lane.b32.xlu1 %v547_v41, %s1473_s18 }
 0x86c   :  { %v597_v42 = vpop.permute.xlu0 %596 }
 0x86d   :  { %v599_v43 = vmul.f32 %v597_v42, %v590_v17 }
 0x86f   :  { %601 = vrot.lane.b32.xlu2 %v599_v43, %s1473_s18 }
 0x874   :  { %v120_v59 = vpop.f32.mrf.mxu0 }
 0x875   :  { %v121_v63 = vadd.f32 %v1552_v5, %v120_v59 }
 0x87c   :  { %v1697_v60 = vpop.f32.mrf.mxu0 }
 0x884   :  { %v1699_v61 = vpop.f32.mrf.mxu0 }
 0x88c   :  { %v1701_v62 = vpop.f32.mrf.mxu0 }
 0x8c9   :  { %v602_v45 = vpop.permute.xlu2 %601 }
 0x8ca   :  { %v1669_v27 = vadd.f32 %v602_v45, %v594_v44 }
 0x8cc   :  { %1411 = vtanh.f32 %v1669_v27 }
 0x8d2   :  { %v1412_v46 = vpop.eup %1411 }
 0x8d3   :  { %607 = vrot.lane.b32.xlu1 %v1412_v46, %s1472_s17 }
 0x8d9   :  { %v550_v49 = vpop.permute.xlu1 %549 }
 0x8da   :  { %v1674_v50 = vadd.f32 %v550_v49, %v542_v48 }
 0x8dc   :  { %1413 = vtanh.f32 %v1674_v50 }
 0x8e2   :  { %v1414_v51 = vpop.eup %1413 }
 0x8e3   :  { %555 = vrot.lane.b32.xlu0 %v1414_v51, %s1472_s17 }
 0x945   :  { %v608_v36 = vpop.permute.xlu1 %607 }
 0x946   :  { %v610_v52 = vmul.f32 %v608_v36, %v590_v17 }
 0x948   :  { %v612_v53 = vpack.c.bf16 %v610_v52, %v610_v52 }
 0x94a   :  { %614 = vrot.lane.b32.xlu2 %v612_v53, %s1473_s18 }
 0x955   :  { %v556_v54 = vpop.permute.xlu0 %555 }
 0x956   :  { %v558_v55 = vmul.f32 %v556_v54, %v538_v31 }
 0x958   :  { %v611_v56 = vpack.c.bf16 %v558_v55, %v558_v55 }
 0x95a   :  { %633 = vrot.lane.b32.xlu0 %v611_v56, %s1473_s18 }
 0x9a4   :  { %v615_v57 = vpop.permute.xlu2 %614 }
 0x9a5   :  { %1323 = vmatmul.msk.bf16.vlgmr.msrb.gmra.mxu2 %vm142_vm5, %v615_v57  ;;  %1327 = vmatmul.msk.bf16.vlgmr.msrb.gmra.mxu0 %vm142_vm5, %v615_v57 }
 0x9a6   :  { %958 = vmatpush.bf16.msrb.mxu2 %v1530_v1  ;;  %1037 = vmatpush.bf16.msrb.mxu0 %v1564_v32 }
 0x9aa   :  { %959 = vmatpush.bf16.msrb.mxu2 %v1539_v3  ;;  %1038 = vmatpush.bf16.msrb.mxu0 %v1575_v34 }
 0x9cc   :  { %v634_v58 = vpop.permute.xlu0 %633 }
 0x9cd   :  { %1324 = vmatmul.msk.bf16.vlgmr.msrb.gmra.mxu3 %vm142_vm5, %v634_v58 }
 0x9ce   :  { %1018 = vmatpush.bf16.msrb.mxu3 %v1569_v33 }
 0x9d2   :  { %1019 = vmatpush.bf16.msrb.mxu3 %v1581_v35 }
 0xa22   :  { %v699_v0 = vpop.f32.mrf.mxu0 }
 0xa23   :  { %v703_v2 = vadd.f32 %v699_v0, %v121_v63 }
 0xa25   :  { %v1328_v4 = vmul.f32 -1.442695, %v703_v2 }
 0xa27   :  { %1415 = vpow2.f32 %v1328_v4 }
 0xa28   :  { %v628_v6 = vpop.f32.mrf.mxu2 }
 0xa2a   :  { %v701_v7 = vpop.f32.mrf.mxu0 }
 0xa2d   :  { %v1416_v8 = vpop.eup %1415 }
 0xa2e   :  { %v707_v9 = vadd.f32 1.0, %v1416_v8 }
 0xa30   :  { %1417 = vrcp.f32 %v707_v9  ;;  %v630_v10 = vpop.f32.mrf.mxu2  ;;  %v719_v14 = vand.u32 2147483648, %v707_v9  ;;  %v717_v16 = vand.u32 2147483647, %v707_v9  ;;  %vm713_vm1 = vweird.f32 %v707_v9 }
 0xa31   :  { %v123_v10 = vadd.f32 %v1552_v5, %v1697_v60 }
 0xa32   :  { %v720_v18 = vor.u32 1.1754944e-38, %v719_v14  ;;  %vm718_vm3 = vcmp.eq.f32.partialorder %v717_v16, 8.507059e+37 }
 0xa36   :  { %v1418_v11 = vpop.eup %1417 }
 0xa37   :  { %v709_v12 = vmul.f32 %v1418_v11, %v707_v9  ;;  %vm714_vm0 = vweird.f32 %v1418_v11 }
 0xa38   :  { %vm715_vm2 = vmor %vm713_vm1, %vm714_vm0 }
 0xa39   :  { %v710_v13 = vsub.f32 1.0, %v709_v12 }
 0xa3b   :  { %v711_v15 = vmul.f32 %v1418_v11, %v710_v13 }
 0xa3d   :  { %v712_v17 = vadd.f32 %v1418_v11, %v711_v15 }
 0xa3f   :  { %v716_v19 = vsel %vm715_vm2, %v1418_v11, %v712_v17 }
 0xa40   :  { %v721_v20 = vsel %vm718_vm3, %v720_v18, %v716_v19 }
 0xa41   :  { %v723_v21 = vmul.f32 2.0, %v721_v20  ;;  %v725_v40 = vmul.f32 %v721_v20, %v1669_v27 }
 0xa43   :  { %v1329_v22 = vadd.f32 -1.0, %v723_v21 }
 0xa45   :  { %727 = vrot.lane.b32.xlu1 %v1329_v22, %s1472_s17 }
 0xa50   :  { %v647_v23 = vpop.f32.mrf.mxu3 }
 0xa51   :  { %v648_v24 = vadd.f32 %v647_v23, %v628_v6 }
 0xa53   :  { %v651_v25 = vadd.f32 %v1604_v47, %v648_v24 }
 0xa55   :  { %v1325_v26 = vmul.f32 -1.442695, %v651_v25 }
 0xa57   :  { %1419 = vpow2.f32 %v1325_v26 }
 0xa58   :  { %v649_v28 = vpop.f32.mrf.mxu3 }
 0xa5d   :  { %v1420_v29 = vpop.eup %1419 }
 0xa5e   :  { %v655_v31 = vadd.f32 1.0, %v1420_v29 }
 0xa60   :  { %1421 = vrcp.f32 %v655_v31  ;;  %v667_v41 = vand.u32 2147483648, %v655_v31  ;;  %v665_v43 = vand.u32 2147483647, %v655_v31  ;;  %vm661_vm6 = vweird.f32 %v655_v31 }
 0xa62   :  { %v668_v45 = vor.u32 1.1754944e-38, %v667_v41  ;;  %vm666_vm8 = vcmp.eq.f32.partialorder %v665_v43, 8.507059e+37 }
 0xa66   :  { %v1422_v37 = vpop.eup %1421 }
 0xa67   :  { %v657_v38 = vmul.f32 %v1422_v37, %v655_v31  ;;  %vm662_vm4 = vweird.f32 %v1422_v37 }
 0xa68   :  { %vm663_vm7 = vmor %vm661_vm6, %vm662_vm4 }
 0xa69   :  { %v658_v39 = vsub.f32 1.0, %v657_v38 }
 0xa6b   :  { %v659_v42 = vmul.f32 %v1422_v37, %v658_v39 }
 0xa6d   :  { %v660_v44 = vadd.f32 %v1422_v37, %v659_v42 }
 0xa6f   :  { %v664_v46 = vsel %vm663_vm7, %v1422_v37, %v660_v44 }
 0xa70   :  { %v669_v48 = vsel %vm666_vm8, %v668_v45, %v664_v46 }
 0xa71   :  { %v671_v49 = vmul.f32 2.0, %v669_v48  ;;  %v673_v57 = vmul.f32 %v669_v48, %v1674_v50 }
 0xa73   :  { %v1326_v51 = vadd.f32 -1.0, %v671_v49 }
 0xa75   :  { %675 = vrot.lane.b32.xlu2 %v1326_v51, %s1472_s17 }
 0xab7   :  { %v728_v30 = vpop.permute.xlu1 %727 }
 0xab8   :  { %v730_v36 = vmul.f32 %v728_v30, %v721_v20 }
 0xaba   :  { %732 = vrot.lane.b32.xlu0 %v730_v36, %s1473_s18 }
 0xacf   :  { %v676_v52 = vpop.permute.xlu2 %675 }
 0xad0   :  { %v678_v53 = vmul.f32 %v676_v52, %v669_v48 }
 0xad2   :  { %680 = vrot.lane.b32.xlu1 %v678_v53, %s1473_s18 }
 0xb2c   :  { %v733_v54 = vpop.permute.xlu0 %732 }
 0xb2d   :  { %v1710_v55 = vadd.f32 %v733_v54, %v725_v40 }
 0xb2f   :  { %1423 = vtanh.f32 %v1710_v55 }
 0xb35   :  { %v1424_v56 = vpop.eup %1423 }
 0xb36   :  { %738 = vrot.lane.b32.xlu2 %v1424_v56, %s1472_s17 }
 0xb44   :  { %v681_v58 = vpop.permute.xlu1 %680 }
 0xb45   :  { %v1715_v59 = vadd.f32 %v681_v58, %v673_v57 }
 0xb47   :  { %1425 = vtanh.f32 %v1715_v59 }
 0xb4d   :  { %v1426_v63 = vpop.eup %1425 }
 0xb4e   :  { %686 = vrot.lane.b32.xlu0 %v1426_v63, %s1472_s17 }
 0xb90   :  { %v739_v0 = vpop.permute.xlu2 %738 }
 0xb91   :  { %v741_v27 = vmul.f32 %v739_v0, %v721_v20 }
 0xb93   :  { %v743_v2 = vpack.c.bf16 %v741_v27, %v741_v27 }
 0xb95   :  { %745 = vrot.lane.b32.xlu1 %v743_v2, %s1473_s18 }
 0xbc0   :  { %v687_v4 = vpop.permute.xlu0 %686 }
 0xbc1   :  { %v689_v6 = vmul.f32 %v687_v4, %v669_v48 }
 0xbc3   :  { %v742_v7 = vpack.c.bf16 %v689_v6, %v689_v6 }
 0xbc5   :  { %764 = vrot.lane.b32.xlu2 %v742_v7, %s1473_s18 }
 0xc07   :  { %v746_v8 = vpop.permute.xlu1 %745 }
 0xc08   :  { %1330 = vmatmul.msk.bf16.vlgmr.msra.gmra.mxu1 %vm142_vm5, %v746_v8  ;;  %1334 = vmatmul.msk.bf16.vlgmr.msra.gmra.mxu3 %vm142_vm5, %v746_v8 }
 0xc09   :  { %1089 = vmatpush.bf16.msra.mxu1 %v1530_v1  ;;  %1168 = vmatpush.bf16.msra.mxu3 %v1564_v32 }
 0xc0d   :  { %1090 = vmatpush.bf16.msra.mxu1 %v1539_v3  ;;  %1169 = vmatpush.bf16.msra.mxu3 %v1575_v34 }
 0xc1f   :  { %v765_v50 = vpop.permute.xlu2 %764 }
 0xc20   :  { %1331 = vmatmul.msk.bf16.vlgmr.msra.gmra.mxu2 %vm142_vm5, %v765_v50 }
 0xc21   :  { %1149 = vmatpush.bf16.msra.mxu2 %v1569_v33 }
 0xc25   :  { %1150 = vmatpush.bf16.msra.mxu2 %v1581_v35 }
 0xc85   :  { %v759_v9 = vpop.f32.mrf.mxu1 }
 0xc8b   :  { %v830_v11 = vpop.f32.mrf.mxu3 }
 0xc8c   :  { %v834_v12 = vadd.f32 %v830_v11, %v123_v10 }
 0xc8d   :  { %v761_v1 = vpop.f32.mrf.mxu1 }
 0xc8e   :  { %v1335_v13 = vmul.f32 -1.442695, %v834_v12 }
 0xc90   :  { %1427 = vpow2.f32 %v1335_v13 }
 0xc93   :  { %v832_v32 = vpop.f32.mrf.mxu3 }
 0xc96   :  { %v1428_v3 = vpop.eup %1427 }
 0xc97   :  { %v838_v14 = vadd.f32 1.0, %v1428_v3 }
 0xc99   :  { %1429 = vrcp.f32 %v838_v14  ;;  %v850_v33 = vand.u32 2147483648, %v838_v14  ;;  %v848_v19 = vand.u32 2147483647, %v838_v14  ;;  %vm844_vm10 = vweird.f32 %v838_v14 }
 0xc9b   :  { %v851_v20 = vor.u32 1.1754944e-38, %v850_v33  ;;  %vm849_vm12 = vcmp.eq.f32.partialorder %v848_v19, 8.507059e+37 }
 0xc9f   :  { %v1430_v34 = vpop.eup %1429 }
 0xca0   :  { %v840_v15 = vmul.f32 %v1430_v34, %v838_v14  ;;  %vm845_vm9 = vweird.f32 %v1430_v34 }
 0xca1   :  { %vm846_vm11 = vmor %vm844_vm10, %vm845_vm9 }
 0xca2   :  { %v841_v16 = vsub.f32 1.0, %v840_v15 }
 0xca3   :  { %v778_v17 = vpop.f32.mrf.mxu2 }
 0xca4   :  { %v779_v18 = vadd.f32 %v778_v17, %v759_v9  ;;  %v842_v35 = vmul.f32 %v1430_v34, %v841_v16  ;;  %v1755_v9 = vld [vmem:[%s1822_s3] ss:$0 sm:$0xff] }
 0xca5   :  { %v126_v10 = vadd.f32 %v1755_v9, %v1699_v61 }
 0xca6   :  { %v782_v5 = vadd.f32 %v1604_v47, %v779_v18  ;;  %v843_v60 = vadd.f32 %v1430_v34, %v842_v35 }
 0xca8   :  { %v1332_v21 = vmul.f32 -1.442695, %v782_v5  ;;  %v847_v22 = vsel %vm846_vm11, %v1430_v34, %v843_v60 }
 0xca9   :  { %v852_v23 = vsel %vm849_vm12, %v851_v20, %v847_v22 }
 0xcaa   :  { %1431 = vpow2.f32 %v1332_v21  ;;  %v854_v24 = vmul.f32 2.0, %v852_v23  ;;  %v856_v53 = vmul.f32 %v852_v23, %v1710_v55 }
 0xcab   :  { %v780_v25 = vpop.f32.mrf.mxu2 }
 0xcac   :  { %v1336_v26 = vadd.f32 -1.0, %v854_v24 }
 0xcae   :  { %858 = vrot.lane.b32.xlu0 %v1336_v26, %s1472_s17 }
 0xcb0   :  { %v1432_v28 = vpop.eup %1431 }
 0xcb1   :  { %v786_v29 = vadd.f32 1.0, %v1432_v28 }
 0xcb3   :  { %1433 = vrcp.f32 %v786_v29  ;;  %v798_v39 = vand.u32 2147483648, %v786_v29  ;;  %v796_v42 = vand.u32 2147483647, %v786_v29  ;;  %vm792_vm14 = vweird.f32 %v786_v29 }
 0xcb5   :  { %v799_v44 = vor.u32 1.1754944e-38, %v798_v39  ;;  %vm797_vm0 = vcmp.eq.f32.partialorder %v796_v42, 8.507059e+37 }
 0xcb9   :  { %v1434_v31 = vpop.eup %1433 }
 0xcba   :  { %v788_v37 = vmul.f32 %v1434_v31, %v786_v29  ;;  %vm793_vm13 = vweird.f32 %v1434_v31 }
 0xcbb   :  { %vm794_vm15 = vmor %vm792_vm14, %vm793_vm13 }
 0xcbc   :  { %v789_v38 = vsub.f32 1.0, %v788_v37 }
 0xcbe   :  { %v790_v41 = vmul.f32 %v1434_v31, %v789_v38 }
 0xcc0   :  { %v791_v43 = vadd.f32 %v1434_v31, %v790_v41 }
 0xcc2   :  { %v795_v45 = vsel %vm794_vm15, %v1434_v31, %v791_v43 }
 0xcc3   :  { %v800_v46 = vsel %vm797_vm0, %v799_v44, %v795_v45 }
 0xcc4   :  { %v802_v48 = vmul.f32 2.0, %v800_v46  ;;  %v804_v57 = vmul.f32 %v800_v46, %v1715_v59 }
 0xcc6   :  { %v1333_v49 = vadd.f32 -1.0, %v802_v48 }
 0xcc8   :  { %806 = vrot.lane.b32.xlu1 %v1333_v49, %s1472_s17 }
 0xd20   :  { %v859_v51 = vpop.permute.xlu0 %858 }
 0xd21   :  { %v861_v30 = vmul.f32 %v859_v51, %v852_v23 }
 0xd23   :  { %863 = vrot.lane.b32.xlu2 %v861_v30, %s1473_s18 }
 0xd3a   :  { %v807_v36 = vpop.permute.xlu1 %806 }
 0xd3b   :  { %v809_v52 = vmul.f32 %v807_v36, %v800_v46 }
 0xd3d   :  { %811 = vrot.lane.b32.xlu0 %v809_v52, %s1473_s18 }
 0xd7d   :  { %v864_v40 = vpop.permute.xlu2 %863 }
 0xd7e   :  { %v1738_v54 = vadd.f32 %v864_v40, %v856_v53 }
 0xd80   :  { %1435 = vtanh.f32 %v1738_v54 }
 0xd86   :  { %v1436_v56 = vpop.eup %1435 }
 0xd87   :  { %869 = vrot.lane.b32.xlu1 %v1436_v56, %s1472_s17 }
 0xdaf   :  { %v812_v58 = vpop.permute.xlu0 %811 }
 0xdb0   :  { %v1743_v63 = vadd.f32 %v812_v58, %v804_v57 }
 0xdb2   :  { %1437 = vtanh.f32 %v1743_v63 }
 0xdb8   :  { %v1438_v0 = vpop.eup %1437 }
 0xdb9   :  { %817 = vrot.lane.b32.xlu2 %v1438_v0, %s1472_s17 }
 0xdf9   :  { %v870_v27 = vpop.permute.xlu1 %869 }
 0xdfa   :  { %v872_v55 = vmul.f32 %v870_v27, %v852_v23 }
 0xdfc   :  { %v874_v2 = vpack.c.bf16 %v872_v55, %v872_v55 }
 0xdfe   :  { %876 = vrot.lane.b32.xlu0 %v874_v2, %s1473_s18 }
 0xe13   :  { %v818_v4 = vpop.permute.xlu2 %817 }
 0xe14   :  { %v820_v6 = vmul.f32 %v818_v4, %v800_v46 }
 0xe16   :  { %v873_v7 = vpack.c.bf16 %v820_v6, %v820_v6 }
 0xe18   :  { %895 = vrot.lane.b32.xlu1 %v873_v7, %s1473_s18 }
 0xe70   :  { %v877_v8 = vpop.permute.xlu0 %876 }
 0xe71   :  { %1337 = vmatmul.msk.bf16.vlgmr.msra.gmra.mxu0 %vm142_vm5, %v877_v8  ;;  %1341 = vmatmul.msk.bf16.vlgmr.msrb.gmra.mxu2 %vm142_vm5, %v877_v8  ;;  %v128_v8 = vadd.f32 %v1755_v9, %v1701_v62 }
 0xe8a   :  { %v896_v59 = vpop.permute.xlu1 %895 }
 0xe8b   :  { %1338 = vmatmul.msk.bf16.vlgmr.msrb.gmra.mxu1 %vm142_vm5, %v896_v59 }
 0xeee   :  { %v890_v50 = vpop.f32.mrf.mxu0 }
 0xef4   :  { %v961_v11 = vpop.f32.mrf.mxu2 }
 0xef5   :  { %v965_v12 = vadd.f32 %v961_v11, %v126_v10 }
 0xef6   :  { %v892_v1 = vpop.f32.mrf.mxu0 }
 0xef7   :  { %v1342_v13 = vmul.f32 -1.442695, %v965_v12 }
 0xef9   :  { %1439 = vpow2.f32 %v1342_v13 }
 0xefc   :  { %v963_v32 = vpop.f32.mrf.mxu2 }
 0xeff   :  { %v1440_v3 = vpop.eup %1439 }
 0xf00   :  { %v969_v14 = vadd.f32 1.0, %v1440_v3 }
 0xf02   :  { %1441 = vrcp.f32 %v969_v14  ;;  %v981_v35 = vand.u32 2147483648, %v969_v14  ;;  %v979_v61 = vand.u32 2147483647, %v969_v14  ;;  %vm975_vm2 = vweird.f32 %v969_v14 }
 0xf04   :  { %v982_v21 = vor.u32 1.1754944e-38, %v981_v35  ;;  %vm980_vm4 = vcmp.eq.f32.partialorder %v979_v61, 8.507059e+37 }
 0xf08   :  { %v1442_v34 = vpop.eup %1441  ;;  %v909_v15 = vpop.f32.mrf.mxu1 }
 0xf09   :  { %v971_v16 = vmul.f32 %v1442_v34, %v969_v14  ;;  %v910_v17 = vadd.f32 %v909_v15, %v890_v50  ;;  %vm976_vm1 = vweird.f32 %v1442_v34 }
 0xf0a   :  { %vm977_vm3 = vmor %vm975_vm2, %vm976_vm1 }
 0xf0b   :  { %v972_v33 = vsub.f32 1.0, %v971_v16  ;;  %v913_v18 = vadd.f32 %v1604_v47, %v910_v17 }
 0xf0d   :  { %v1339_v19 = vmul.f32 -1.442695, %v913_v18  ;;  %v973_v5 = vmul.f32 %v1442_v34, %v972_v33 }
 0xf0f   :  { %1443 = vpow2.f32 %v1339_v19  ;;  %v974_v60 = vadd.f32 %v1442_v34, %v973_v5 }
 0xf10   :  { %v911_v20 = vpop.f32.mrf.mxu1 }
 0xf11   :  { %v978_v22 = vsel %vm977_vm3, %v1442_v34, %v974_v60  ;;  %v1470_v60 = vld [vmem:[%s1825_s6] ss:$0 sm:$0xff] }
 0xf12   :  { %v983_v23 = vsel %vm980_vm4, %v982_v21, %v978_v22 }
 0xf13   :  { %v985_v24 = vmul.f32 2.0, %v983_v23  ;;  %v987_v36 = vmul.f32 %v983_v23, %v1738_v54 }
 0xf15   :  { %v1444_v25 = vpop.eup %1443  ;;  %v1343_v26 = vadd.f32 -1.0, %v985_v24 }
 0xf16   :  { %v917_v28 = vadd.f32 1.0, %v1444_v25 }
 0xf17   :  { %989 = vrot.lane.b32.xlu2 %v1343_v26, %s1472_s17 }
 0xf18   :  { %1445 = vrcp.f32 %v917_v28  ;;  %v929_v37 = vand.u32 2147483648, %v917_v28  ;;  %v927_v39 = vand.u32 2147483647, %v917_v28  ;;  %vm923_vm7 = vweird.f32 %v917_v28 }
 0xf1a   :  { %v930_v42 = vor.u32 1.1754944e-38, %v929_v37  ;;  %vm928_vm9 = vcmp.eq.f32.partialorder %v927_v39, 8.507059e+37 }
 0xf1e   :  { %v1446_v47 = vpop.eup %1445 }
 0xf1f   :  { %v919_v29 = vmul.f32 %v1446_v47, %v917_v28  ;;  %vm924_vm6 = vweird.f32 %v1446_v47 }
 0xf20   :  { %vm925_vm8 = vmor %vm923_vm7, %vm924_vm6  ;;  %vm1247_vm7 = vcmask 7168  }
 0xf21   :  { %v920_v31 = vsub.f32 1.0, %v919_v29 }
 0xf23   :  { %v921_v38 = vmul.f32 %v1446_v47, %v920_v31 }
 0xf25   :  { %v922_v41 = vadd.f32 %v1446_v47, %v921_v38 }
 0xf27   :  { %v926_v43 = vsel %vm925_vm8, %v1446_v47, %v922_v41 }
 0xf28   :  { %v931_v44 = vsel %vm928_vm9, %v930_v42, %v926_v43 }
 0xf29   :  { %v933_v45 = vmul.f32 2.0, %v931_v44  ;;  %v935_v56 = vmul.f32 %v931_v44, %v1743_v63 }
 0xf2b   :  { %v1340_v46 = vadd.f32 -1.0, %v933_v45 }
 0xf2d   :  { %937 = vrot.lane.b32.xlu0 %v1340_v46, %s1472_s17 }
 0xf71   :  { %v990_v48 = vpop.permute.xlu2 %989 }
 0xf72   :  { %v992_v49 = vmul.f32 %v990_v48, %v983_v23 }
 0xf74   :  { %994 = vrot.lane.b32.xlu1 %v992_v49, %s1473_s18 }
 0xf9f   :  { %v938_v51 = vpop.permute.xlu0 %937 }
 0xfa0   :  { %v940_v30 = vmul.f32 %v938_v51, %v931_v44 }
 0xfa2   :  { %942 = vrot.lane.b32.xlu2 %v940_v30, %s1473_s18 }
 0xfe6   :  { %v995_v52 = vpop.permute.xlu1 %994 }
 0xfe7   :  { %v1765_v53 = vadd.f32 %v995_v52, %v987_v36 }
 0xfe9   :  { %1447 = vtanh.f32 %v1765_v53 }
 0xfef   :  { %v1448_v40 = vpop.eup %1447 }
 0xff0   :  { %1000 = vrot.lane.b32.xlu0 %v1448_v40, %s1472_s17 }
 0xffc   :  { %v943_v57 = vpop.permute.xlu2 %942 }
 0xffd   :  { %v1770_v58 = vadd.f32 %v943_v57, %v935_v56 }
 0xfff   :  { %1449 = vtanh.f32 %v1770_v58 }
0x1005   :  { %v1450_v0 = vpop.eup %1449 }
0x1006   :  { %948 = vrot.lane.b32.xlu1 %v1450_v0, %s1472_s17 }
0x1062   :  { %v1001_v27 = vpop.permute.xlu0 %1000 }
0x1063   :  { %v1003_v54 = vmul.f32 %v1001_v27, %v983_v23 }
0x1065   :  { %v1005_v55 = vpack.c.bf16 %v1003_v54, %v1003_v54 }
0x1067   :  { %1007 = vrot.lane.b32.xlu2 %v1005_v55, %s1473_s18 }
0x1078   :  { %v949_v2 = vpop.permute.xlu1 %948 }
0x1079   :  { %v951_v4 = vmul.f32 %v949_v2, %v931_v44 }
0x107b   :  { %v1004_v6 = vpack.c.bf16 %v951_v4, %v951_v4 }
0x107d   :  { %1026 = vrot.lane.b32.xlu0 %v1004_v6, %s1473_s18 }
0x10c1   :  { %v1008_v7 = vpop.permute.xlu2 %1007 }
0x10c2   :  { %1344 = vmatmul.msk.bf16.vlgmr.msrb.gmra.mxu3 %vm142_vm5, %v1008_v7  ;;  %1348 = vmatmul.msk.bf16.vlgmr.msra.gmra.mxu1 %vm142_vm5, %v1008_v7 }
0x10ef   :  { %v1027_v63 = vpop.permute.xlu0 %1026 }
0x10f0   :  { %1345 = vmatmul.msk.bf16.vlgmr.msrb.gmra.mxu0 %vm142_vm5, %v1027_v63 }
0x113f   :  { %v1092_v59 = vpop.f32.mrf.mxu1 }
0x1140   :  { %v1096_v50 = vadd.f32 %v1092_v59, %v128_v8 }
0x1142   :  { %v1349_v10 = vmul.f32 -1.442695, %v1096_v50 }
0x1144   :  { %1451 = vpow2.f32 %v1349_v10 }
0x1145   :  { %v1021_v11 = vpop.f32.mrf.mxu3 }
0x1147   :  { %v1094_v12 = vpop.f32.mrf.mxu1 }
0x114a   :  { %v1452_v1 = vpop.eup %1451 }
0x114b   :  { %v1100_v13 = vadd.f32 1.0, %v1452_v1 }
0x114d   :  { %1453 = vrcp.f32 %v1100_v13  ;;  %v1023_v32 = vpop.f32.mrf.mxu3  ;;  %v1112_v15 = vand.u32 2147483648, %v1100_v13  ;;  %v1110_v17 = vand.u32 2147483647, %v1100_v13  ;;  %vm1106_vm11 = vweird.f32 %v1100_v13 }
0x114f   :  { %v1113_v62 = vor.u32 1.1754944e-38, %v1112_v15  ;;  %vm1111_vm13 = vcmp.eq.f32.partialorder %v1110_v17, 8.507059e+37 }
0x1153   :  { %v1454_v3 = vpop.eup %1453 }
0x1154   :  { %v1102_v14 = vmul.f32 %v1454_v3, %v1100_v13  ;;  %vm1107_vm10 = vweird.f32 %v1454_v3 }
0x1155   :  { %vm1108_vm12 = vmor %vm1106_vm11, %vm1107_vm10 }
0x1156   :  { %v1103_v34 = vsub.f32 1.0, %v1102_v14 }
0x1158   :  { %v1104_v16 = vmul.f32 %v1454_v3, %v1103_v34 }
0x115a   :  { %v1105_v33 = vadd.f32 %v1454_v3, %v1104_v16 }
0x115c   :  { %v1109_v9 = vsel %vm1108_vm12, %v1454_v3, %v1105_v33 }
0x115d   :  { %v1114_v18 = vsel %vm1111_vm13, %v1113_v62, %v1109_v9 }
0x115e   :  { %v1116_v35 = vmul.f32 2.0, %v1114_v18  ;;  %v1118_v49 = vmul.f32 %v1114_v18, %v1765_v53 }
0x1160   :  { %v1350_v19 = vadd.f32 -1.0, %v1116_v35 }
0x1162   :  { %1120 = vrot.lane.b32.xlu2 %v1350_v19, %s1472_s17 }
0x116d   :  { %v1040_v5 = vpop.f32.mrf.mxu0 }
0x116e   :  { %v1041_v61 = vadd.f32 %v1040_v5, %v1021_v11 }
0x1170   :  { %v1044_v20 = vadd.f32 %v1470_v60, %v1041_v61 }
0x1172   :  { %v1346_v21 = vmul.f32 -1.442695, %v1044_v20  ;;  %v1217_v20 = vld [vmem:[%s1826_s7 + $0x18] sm:$0xff] }
0x1173   :  { %1239 = vmatpush.msra.mxu0 %v1217_v20 }
0x1174   :  { %1455 = vpow2.f32 %v1346_v21  ;;  %v1216_v21 = vld [vmem:[%s1826_s7 + $0x10] sm:$0xff] }
0x1175   :  { %v1042_v22 = vpop.f32.mrf.mxu0  ;;  %1240 = vmatpush.msra.mxu0 %v1216_v21 }
0x1176   :  { %v1215_v22 = vld [vmem:[%s1826_s7 + $0x8] sm:$0xff] }
0x1177   :  { %1241 = vmatpush.msra.mxu0 %v1215_v22 }
0x117a   :  { %v1456_v23 = vpop.eup %1455 }
0x117b   :  { %v1048_v24 = vadd.f32 1.0, %v1456_v23  ;;  %v1214_v23 = vld [vmem:[%s1826_s7] sm:$0xff] }
0x117c   :  { %1242 = vmatpush.msra.mxu0 %v1214_v23 }
0x117d   :  { %1457 = vrcp.f32 %v1048_v24  ;;  %v1060_v47 = vand.u32 2147483648, %v1048_v24  ;;  %v1058_v31 = vand.u32 2147483647, %v1048_v24  ;;  %vm1054_vm15 = vweird.f32 %v1048_v24 }
0x117f   :  { %v1061_v38 = vor.u32 1.1754944e-38, %v1060_v47  ;;  %vm1059_vm1 = vcmp.eq.f32.partialorder %v1058_v31, 8.507059e+37 }
0x1183   :  { %v1458_v25 = vpop.eup %1457 }
0x1184   :  { %v1050_v26 = vmul.f32 %v1458_v25, %v1048_v24  ;;  %vm1055_vm14 = vweird.f32 %v1458_v25 }
0x1185   :  { %vm1056_vm0 = vmor %vm1054_vm15, %vm1055_vm14 }
0x1186   :  { %v1051_v28 = vsub.f32 1.0, %v1050_v26  ;;  %v14_v26 = vstv %s1827_s8 }
0x1187   :  { %15 = vst [vmem:[#allocation2] sm:$0x1] %v14_v26 }
0x1188   :  { %v1052_v29 = vmul.f32 %v1458_v25, %v1051_v28 }
0x118a   :  { %v1053_v37 = vadd.f32 %v1458_v25, %v1052_v29 }
0x118c   :  { %v1057_v39 = vsel %vm1056_vm0, %v1458_v25, %v1053_v37 }
0x118d   :  { %v1062_v41 = vsel %vm1059_vm1, %v1061_v38, %v1057_v39 }
0x118e   :  { %v1064_v42 = vmul.f32 2.0, %v1062_v41  ;;  %v1066_v52 = vmul.f32 %v1062_v41, %v1770_v58  ;;  %v1372_v47 = vld [vmem:[#allocation2] ss:$0 sm:$0xff] }
0x1190   :  { %v1347_v43 = vadd.f32 -1.0, %v1064_v42 }
0x1192   :  { %1068 = vrot.lane.b32.xlu1 %v1347_v43, %s1472_s17 }
0x11bc   :  { %v1121_v44 = vpop.permute.xlu2 %1120 }
0x11bd   :  { %v1123_v45 = vmul.f32 %v1121_v44, %v1114_v18 }
0x11bf   :  { %1125 = vrot.lane.b32.xlu1 %v1123_v45, %s1473_s18 }
0x1204   :  { %v1069_v46 = vpop.permute.xlu1 %1068 }
0x1205   :  { %v1071_v48 = vmul.f32 %v1069_v46, %v1062_v41 }
0x1207   :  { %1073 = vrot.lane.b32.xlu0 %v1071_v48, %s1473_s18 }
0x1231   :  { %v1126_v51 = vpop.permute.xlu1 %1125 }
0x1232   :  { %v1128_v30 = vadd.f32 %v1126_v51, %v1118_v49 }
0x1234   :  { %1459 = vtanh.f32 %v1128_v30 }
0x123a   :  { %v1460_v36 = vpop.eup %1459 }
0x123b   :  { %1131 = vrot.lane.b32.xlu0 %v1460_v36, %s1472_s17 }
0x1279   :  { %v1074_v40 = vpop.permute.xlu0 %1073 }
0x127a   :  { %v1076_v56 = vadd.f32 %v1074_v40, %v1066_v52 }
0x127c   :  { %1461 = vtanh.f32 %v1076_v56 }
0x1282   :  { %v1462_v57 = vpop.eup %1461 }
0x1283   :  { %1079 = vrot.lane.b32.xlu2 %v1462_v57, %s1472_s17 }
0x12ad   :  { %v1132_v0 = vpop.permute.xlu0 %1131 }
0x12ae   :  { %v1134_v27 = vmul.f32 %v1132_v0, %v1114_v18 }
0x12b0   :  { %v1136_v54 = vpack.c.bf16 %v1134_v27, %v1134_v27 }
0x12b2   :  { %1138 = vrot.lane.b32.xlu1 %v1136_v54, %s1473_s18 }
0x12dd   :  { %v1080_v53 = vpop.permute.xlu2 %1079 }
0x12de   :  { %v1082_v55 = vmul.f32 %v1080_v53, %v1062_v41 }
0x12e0   :  { %v1135_v2 = vpack.c.bf16 %v1082_v55, %v1082_v55 }
0x12e2   :  { %1157 = vrot.lane.b32.xlu2 %v1135_v2, %s1473_s18 }
0x1324   :  { %v1139_v4 = vpop.permute.xlu1 %1138 }
0x1325   :  { %1351 = vmatmul.msk.bf16.vlgmr.msra.gmra.mxu2 %vm142_vm5, %v1139_v4 }
0x133c   :  { %v1158_v58 = vpop.permute.xlu2 %1157 }
0x133d   :  { %1352 = vmatmul.msk.bf16.vlgmr.msra.gmra.mxu3 %vm142_vm5, %v1158_v58 }
0x13a8   :  { %v1152_v6 = vpop.f32.mrf.mxu2 }
0x13b0   :  { %v1154_v7 = vpop.f32.mrf.mxu2 }
0x13c0   :  { %v1171_v63 = vpop.f32.mrf.mxu3 }
0x13c1   :  { %v1172_v8 = vadd.f32 %v1171_v63, %v1152_v6 }
0x13c3   :  { %v1175_v59 = vadd.f32 %v1470_v60, %v1172_v8 }
0x13c5   :  { %v1353_v50 = vmul.f32 -1.442695, %v1175_v59 }
0x13c7   :  { %1463 = vpow2.f32 %v1353_v50 }
0x13c8   :  { %v1173_v10 = vpop.f32.mrf.mxu3 }
0x13cd   :  { %v1464_v11 = vpop.eup %1463 }
0x13ce   :  { %v1179_v12 = vadd.f32 1.0, %v1464_v11 }
0x13d0   :  { %1465 = vrcp.f32 %v1179_v12  ;;  %v1191_v3 = vand.u32 2147483648, %v1179_v12  ;;  %v1189_v34 = vand.u32 2147483647, %v1179_v12  ;;  %vm1185_vm3 = vweird.f32 %v1179_v12 }
0x13d2   :  { %v1192_v16 = vor.u32 1.1754944e-38, %v1191_v3  ;;  %vm1190_vm6 = vcmp.eq.f32.partialorder %v1189_v34, 8.507059e+37 }
0x13d6   :  { %v1466_v1 = vpop.eup %1465 }
0x13d7   :  { %v1181_v13 = vmul.f32 %v1466_v1, %v1179_v12  ;;  %vm1186_vm2 = vweird.f32 %v1466_v1 }
0x13d8   :  { %vm1187_vm4 = vmor %vm1185_vm3, %vm1186_vm2 }
0x13d9   :  { %v1182_v32 = vsub.f32 1.0, %v1181_v13 }
0x13db   :  { %v1183_v14 = vmul.f32 %v1466_v1, %v1182_v32 }
0x13dd   :  { %v1184_v15 = vadd.f32 %v1466_v1, %v1183_v14 }
0x13df   :  { %v1188_v17 = vsel %vm1187_vm4, %v1466_v1, %v1184_v15 }
0x13e0   :  { %v1193_v33 = vsel %vm1190_vm6, %v1192_v16, %v1188_v17 }
0x13e1   :  { %v1195_v62 = vmul.f32 2.0, %v1193_v33  ;;  %v1197_v19 = vmul.f32 %v1193_v33, %v1076_v56 }
0x13e3   :  { %v1354_v9 = vadd.f32 -1.0, %v1195_v62 }
0x13e5   :  { %1199 = vrot.lane.b32.xlu0 %v1354_v9, %s1472_s17 }
0x1457   :  { %v1200_v18 = vpop.permute.xlu0 %1199 }
0x1458   :  { %v1202_v35 = vmul.f32 %v1200_v18, %v1193_v33 }
0x145a   :  { %1204 = vrot.lane.b32.xlu1 %v1202_v35, %s1473_s18 }
0x14cc   :  { %v1205_v5 = vpop.permute.xlu1 %1204 }
0x14cd   :  { %v1207_v61 = vadd.f32 %v1205_v5, %v1197_v19 }
0x14cf   :  { %1467 = vtanh.f32 %v1207_v61 }
0x14d5   :  { %v1468_v60 = vpop.eup %1467 }
0x14d6   :  { %1210 = vrot.lane.b32.xlu2 %v1468_v60, %s1472_s17 }
0x1530   :  { %v1211_v24 = vpop.permute.xlu2 %1210 }
0x1531   :  { %v1213_v25 = vmul.f32 %v1211_v24, %v1193_v33 }
0x1533   :  { %1223 = vrot.lane.b32.xlu0 %v1213_v25, %s1473_s18 }
0x15a5   :  { %v1224_v28 = vpop.permute.xlu0 %1223 }
0x15a6   :  { %1355 = vmatmul.msk.f32.vlgmr.msra.gmra.mxu0 %vm142_vm5, %v1224_v28 }
0x1623   :  { %v1244_v29 = vpop.f32.mrf.mxu0 }
0x1624   :  { %v1245_v31 = vadd.f32 %v1372_v47, %v1244_v29 }
0x1626   :  { %1248 = vst.msk [vmem:[%s1828_s9] sm:$0xff] %vm1247_vm7, %v1245_v31 }

</bundles_post_ra>
